<compile_context>
chip_gen: v5e
topology: v5e:2x2
jax: 0.10.0
libtpu: 0.0.40
codegen_flags: <defaults>
</compile_context>

<pallas_src>
import functools

import jax
import jax.numpy as jnp
import numpy as np
from jax.experimental import pallas as pl
from jax.experimental.pallas import tpu as pltpu

D_EMB = 640     # fixed by the module: Linear(640, 64), Linear(64, 640)
D_HID = 64
TEMP = 0.07     # config['clip']['temp']


def _l2_normalize(v, eps=1e-12):
    # matches torch.nn.functional.normalize(p=2, dim=-1)
    norm = jnp.sqrt(jnp.sum(v * v, axis=-1, keepdims=True))
    return v / jnp.maximum(norm, eps)


def _region_clip_semi_kernel(x_ref, w1_ref, b1_ref, w2_ref, b2_ref,
                             tcls_ref, wm_ref,
                             nodes_ref, text_ref, pred_ref,
                             *, batch, regions, num_classes):
    f32 = jnp.float32
    bf16 = jnp.bfloat16

    # --- NN over all B*N region rows at once: Linear(640,64) -> ReLU -> Linear(64,640)
    x = x_ref[...]                                                   # (B*N, 640) bf16
    h = jnp.dot(x, w1_ref[...], preferred_element_type=f32) + b1_ref[...]
    h = jnp.maximum(h, 0.0)                                          # f32 on the VPU
    nodes = jnp.dot(h.astype(bf16), w2_ref[...],
                    preferred_element_type=f32) + b2_ref[...]        # (B*N, 640) f32
    nodes_ref[...] = nodes                                           # batch_region_nodes

    # --- per-image max over regions (torch: region_nodes.max(dim=0, keepdim=True))
    pooled = jnp.concatenate(
        [jnp.max(nodes[b * regions:(b + 1) * regions], axis=0, keepdims=True)
         for b in range(batch)], axis=0)                             # (B, 640) f32

    # TODO(synk): Learned_Object wraps the frozen CLIP text encoder with learned prompts;
    # replaced by a deterministic surrogate: class embeddings + linear meta-net on the
    # pooled region feature, batched into a single (B,640)@(640,640) matmul.
    meta = jnp.dot(pooled.astype(bf16), wm_ref[...],
                   preferred_element_type=f32)                       # (B, 640) f32
    text = tcls_ref[...].astype(f32)[None, :, :] + meta[:, None, :]  # (B, C, 640) f32
    text_ref[...] = text                                             # batch_text_embs

    # --- F.normalize + cosine logits / temp
    pooled_n = _l2_normalize(pooled)                                 # (B, 640)
    text_n = _l2_normalize(text)                                     # (B, C, 640)
    pred = jnp.sum(pooled_n[:, None, :] * text_n, axis=-1) / TEMP    # (B, C)

    # torch: idx = node_pred[:, 1].argmax(-1) over the length-1 pooled axis is always 0,
    # so node_pred[idx][None, :] is just the row itself.
    pred_ref[...] = jnp.zeros_like(pred_ref)     # lane-dense (B, 128*k) slab
    pred_ref[:, 0:num_classes] = pred


def region_clip_semi_forward(region_embs, params):
    """region_embs: (B, N, 640) f32 -> (preds (B,C), nodes (B,N,640), texts (B,C,640))."""
    B, N, D = region_embs.shape
    assert D == D_EMB
    w1, b1, w2, b2, tcls, wm = params
    C = tcls.shape[0]
    c_pad = 128 * pl.cdiv(C, 128)                # lane-dense prediction slab width

    # Flatten to (B*N, 640) and feed bf16 to the MXU; all accumulation stays f32.
    x2d = region_embs.astype(jnp.bfloat16).reshape(B * N, D)

    kernel = functools.partial(_region_clip_semi_kernel,
                               batch=B, regions=N, num_classes=C)
    vm = pl.BlockSpec(memory_space=pltpu.MemorySpace.VMEM)

    nodes2d, texts, preds_pad = pl.pallas_call(
        kernel,
        out_shape=(
            jax.ShapeDtypeStruct((B * N, D), jnp.float32),   # batch_region_nodes (flat)
            jax.ShapeDtypeStruct((B, C, D), jnp.float32),    # batch_text_embs
            jax.ShapeDtypeStruct((B, c_pad), jnp.float32),   # padded region_node_preds
        ),
        in_specs=[vm, vm, vm, vm, vm, vm, vm],
        out_specs=(vm, vm, vm),
        compiler_params=pltpu.CompilerParams(vmem_limit_bytes=16 << 20),
    )(x2d, w1, b1, w2, b2, tcls, wm)

    preds = preds_pad[:, :C]
    nodes = nodes2d.reshape(B, N, D)
    return preds, nodes, texts


def reference_forward(region_embs, params):
    """Pure-JAX reference mirroring the PyTorch forward (linear branch), with the same
    bf16-operand / f32-accumulation policy as the kernel."""
    w1, b1, w2, b2, tcls, wm = params
    f32, bf16 = jnp.float32, jnp.bfloat16
    preds, nodes_all, texts = [], [], []
    for i in range(region_embs.shape[0]):
        x = region_embs[i].astype(bf16)
        h = jnp.maximum(jnp.dot(x, w1, preferred_element_type=f32) + b1[0], 0.0)
        nodes = jnp.dot(h.astype(bf16), w2, preferred_element_type=f32) + b2[0]
        nodes_all.append(nodes)
        pooled = jnp.max(nodes, axis=0, keepdims=True)                       # (1, 640)
        text = tcls.astype(f32) + jnp.dot(pooled.astype(bf16), wm,
                                          preferred_element_type=f32)        # (C, 640)
        texts.append(text)
        pn = _l2_normalize(pooled)
        tn = _l2_normalize(text)
        node_pred = jnp.sum(pn[:, None, :] * tn[None, :, :], axis=-1) / TEMP  # (1, C)
        idx = jnp.argmax(node_pred[:, 1], axis=-1)
        preds.append(node_pred[idx][None, :])
    return (jnp.concatenate(preds, axis=0),
            jnp.stack(nodes_all, axis=0),
            jnp.stack(texts, axis=0))


def make_params(key, num_classes):
    ks = jax.random.split(key, 6)
    w1 = (jax.random.normal(ks[0], (D_EMB, D_HID), jnp.float32) * 0.02).astype(jnp.bfloat16)
    b1 = jax.random.normal(ks[1], (1, D_HID), jnp.float32) * 0.01
    w2 = (jax.random.normal(ks[2], (D_HID, D_EMB), jnp.float32) * 0.02).astype(jnp.bfloat16)
    b2 = jax.random.normal(ks[3], (1, D_EMB), jnp.float32) * 0.01
    tcls = (jax.random.normal(ks[4], (num_classes, D_EMB), jnp.float32) * 0.05).astype(jnp.bfloat16)
    wm = (jax.random.normal(ks[5], (D_EMB, D_EMB), jnp.float32) * 0.01).astype(jnp.bfloat16)
    return (w1, b1, w2, b2, tcls, wm)


if __name__ == "__main__":
    key = jax.random.PRNGKey(0)
    k_in, k_par = jax.random.split(key)

    B, N, C = 2, 8, 8     # batch, superpixel regions per image, classes
    # region_embs stand in for clip.encode_image(region_sampling(x, regions)) -> (N, 640)/image
    region_embs = jax.random.normal(k_in, (B, N, D_EMB), jnp.float32)
    params = make_params(k_par, C)

    preds, nodes, texts = region_clip_semi_forward(region_embs, params)
    jax.block_until_ready((preds, nodes, texts))

    ref_preds, ref_nodes, ref_texts = reference_forward(region_embs, params)
    np.testing.assert_allclose(np.asarray(nodes), np.asarray(ref_nodes), rtol=2e-3, atol=2e-3)
    np.testing.assert_allclose(np.asarray(texts), np.asarray(ref_texts), rtol=2e-3, atol=2e-3)
    np.testing.assert_allclose(np.asarray(preds), np.asarray(ref_preds), rtol=2e-3, atol=2e-3)

    print("KERNEL_OK")
</pallas_src>

<mosaic_0001>
module attributes {stable_mosaic.version = 11 : i64} {
  func.func @_region_clip_semi_kernel(%arg0: memref<16x640xbf16, #tpu.memory_space<vmem>>, %arg1: memref<640x64xbf16, #tpu.memory_space<vmem>>, %arg2: memref<1x64xf32, #tpu.memory_space<vmem>>, %arg3: memref<64x640xbf16, #tpu.memory_space<vmem>>, %arg4: memref<1x640xf32, #tpu.memory_space<vmem>>, %arg5: memref<8x640xbf16, #tpu.memory_space<vmem>>, %arg6: memref<640x640xbf16, #tpu.memory_space<vmem>>, %arg7: memref<16x640xf32, #tpu.memory_space<vmem>>, %arg8: memref<2x8x640xf32, #tpu.memory_space<vmem>>, %arg9: memref<2x128xf32, #tpu.memory_space<vmem>>) attributes {dimension_semantics = [], scalar_prefetch = 0 : i64, scratch_operands = 0 : i64, tpu.core_type = #tpu.core_type<tc>} {
    %c0 = arith.constant 0 : index
    %c0_0 = arith.constant 0 : index
    %0 = vector.load %arg0[%c0, %c0_0] : memref<16x640xbf16, #tpu.memory_space<vmem>>, vector<16x640xbf16>
    %c0_1 = arith.constant 0 : index
    %c0_2 = arith.constant 0 : index
    %1 = vector.load %arg1[%c0_1, %c0_2] : memref<640x64xbf16, #tpu.memory_space<vmem>>, vector<640x64xbf16>
    %cst = arith.constant dense<0.000000e+00> : vector<16x64xf32>
    %2 = tpu.matmul %0, %1, %cst {dimension_numbers = #tpu.dot_dimension_numbers<[1], [0], [0], [1], [0, 0, 1, 1], [], []>} : vector<16x640xbf16>, vector<640x64xbf16>, vector<16x64xf32> -> vector<16x64xf32>
    %c0_3 = arith.constant 0 : index
    %c0_4 = arith.constant 0 : index
    %3 = vector.load %arg2[%c0_3, %c0_4] : memref<1x64xf32, #tpu.memory_space<vmem>>, vector<1x64xf32>
    %4 = vector.broadcast %3 : vector<1x64xf32> to vector<16x64xf32>
    %5 = arith.addf %2, %4 : vector<16x64xf32>
    %cst_5 = arith.constant 0.000000e+00 : f32
    %6 = vector.broadcast %cst_5 : f32 to vector<16x64xf32>
    %7 = arith.maximumf %5, %6 : vector<16x64xf32>
    %8 = arith.truncf %7 : vector<16x64xf32> to vector<16x64xbf16>
    %c0_6 = arith.constant 0 : index
    %c0_7 = arith.constant 0 : index
    %9 = vector.load %arg3[%c0_6, %c0_7] : memref<64x640xbf16, #tpu.memory_space<vmem>>, vector<64x640xbf16>
    %cst_8 = arith.constant dense<0.000000e+00> : vector<16x640xf32>
    %10 = tpu.matmul %8, %9, %cst_8 {dimension_numbers = #tpu.dot_dimension_numbers<[1], [0], [0], [1], [0, 0, 1, 1], [], []>} : vector<16x64xbf16>, vector<64x640xbf16>, vector<16x640xf32> -> vector<16x640xf32>
    %c0_9 = arith.constant 0 : index
    %c0_10 = arith.constant 0 : index
    %11 = vector.load %arg4[%c0_9, %c0_10] : memref<1x640xf32, #tpu.memory_space<vmem>>, vector<1x640xf32>
    %12 = vector.broadcast %11 : vector<1x640xf32> to vector<16x640xf32>
    %13 = arith.addf %10, %12 : vector<16x640xf32>
    %c0_11 = arith.constant 0 : index
    %c0_12 = arith.constant 0 : index
    %14 = vector.load %arg7[%c0_11, %c0_12] : memref<16x640xf32, #tpu.memory_space<vmem>>, vector<16x640xf32>
    tpu.vector_store %arg7[%c0_11, %c0_12], %13 {strides = array<i32>} : memref<16x640xf32, #tpu.memory_space<vmem>>, vector<16x640xf32>,
    %15 = vector.extract_strided_slice %13 {offsets = [0, 0], sizes = [8, 640], strides = [1, 1]} : vector<16x640xf32> to vector<8x640xf32>
    %cst_13 = arith.constant dense<0xFF800000> : vector<640xf32>
    %16 = vector.multi_reduction <maximumf>, %15, %cst_13 [0] : vector<8x640xf32> to vector<640xf32>
    %17 = vector.shape_cast %16 : vector<640xf32> to vector<1x640xf32>
    %18 = vector.extract_strided_slice %13 {offsets = [8, 0], sizes = [8, 640], strides = [1, 1]} : vector<16x640xf32> to vector<8x640xf32>
    %cst_14 = arith.constant dense<0xFF800000> : vector<640xf32>
    %19 = vector.multi_reduction <maximumf>, %18, %cst_14 [0] : vector<8x640xf32> to vector<640xf32>
    %20 = vector.shape_cast %19 : vector<640xf32> to vector<1x640xf32>
    %21 = tpu.concatenate %17, %20 in 0 : vector<1x640xf32>, vector<1x640xf32> -> vector<2x640xf32>
    %22 = arith.truncf %21 : vector<2x640xf32> to vector<2x640xbf16>
    %c0_15 = arith.constant 0 : index
    %c0_16 = arith.constant 0 : index
    %23 = vector.load %arg6[%c0_15, %c0_16] : memref<640x640xbf16, #tpu.memory_space<vmem>>, vector<640x640xbf16>
    %cst_17 = arith.constant dense<0.000000e+00> : vector<2x640xf32>
    %24 = tpu.matmul %22, %23, %cst_17 {dimension_numbers = #tpu.dot_dimension_numbers<[1], [0], [0], [1], [0, 0, 1, 1], [], []>} : vector<2x640xbf16>, vector<640x640xbf16>, vector<2x640xf32> -> vector<2x640xf32>
    %c0_18 = arith.constant 0 : index
    %c0_19 = arith.constant 0 : index
    %25 = vector.load %arg5[%c0_18, %c0_19] : memref<8x640xbf16, #tpu.memory_space<vmem>>, vector<8x640xbf16>
    %26 = arith.extf %25 : vector<8x640xbf16> to vector<8x640xf32>
    %27 = vector.shape_cast %26 : vector<8x640xf32> to vector<1x8x640xf32>
    %28 = vector.shape_cast %24 : vector<2x640xf32> to vector<2x1x640xf32>
    %29 = vector.broadcast %27 : vector<1x8x640xf32> to vector<2x8x640xf32>
    %30 = vector.broadcast %28 : vector<2x1x640xf32> to vector<2x8x640xf32>
    %31 = arith.addf %29, %30 : vector<2x8x640xf32>
    %c0_20 = arith.constant 0 : index
    %c0_21 = arith.constant 0 : index
    %c0_22 = arith.constant 0 : index
    %32 = vector.load %arg8[%c0_20, %c0_21, %c0_22] : memref<2x8x640xf32, #tpu.memory_space<vmem>>, vector<2x8x640xf32>
    tpu.vector_store %arg8[%c0_20, %c0_21, %c0_22], %31 {strides = array<i32>} : memref<2x8x640xf32, #tpu.memory_space<vmem>>, vector<2x8x640xf32>,
    %33 = arith.mulf %21, %21 : vector<2x640xf32>
    %cst_23 = arith.constant dense<0.000000e+00> : vector<2xf32>
    %34 = vector.multi_reduction <add>, %33, %cst_23 [1] : vector<2x640xf32> to vector<2xf32>
    %35 = vector.shape_cast %34 : vector<2xf32> to vector<2x1xf32>
    %36 = math.sqrt %35 : vector<2x1xf32>
    %cst_24 = arith.constant 9.99999996E-13 : f32
    %37 = vector.broadcast %cst_24 : f32 to vector<2x1xf32>
    %38 = arith.maximumf %36, %37 : vector<2x1xf32>
    %39 = vector.broadcast %38 : vector<2x1xf32> to vector<2x640xf32>
    %40 = arith.divf %21, %39 : vector<2x640xf32>
    %41 = arith.mulf %31, %31 : vector<2x8x640xf32>
    %cst_25 = arith.constant dense<0.000000e+00> : vector<2x8xf32>
    %42 = vector.multi_reduction <add>, %41, %cst_25 [2] : vector<2x8x640xf32> to vector<2x8xf32>
    %43 = vector.shape_cast %42 : vector<2x8xf32> to vector<2x8x1xf32>
    %44 = math.sqrt %43 : vector<2x8x1xf32>
    %cst_26 = arith.constant 9.99999996E-13 : f32
    %45 = vector.broadcast %cst_26 : f32 to vector<2x8x1xf32>
    %46 = arith.maximumf %44, %45 : vector<2x8x1xf32>
    %47 = vector.broadcast %46 : vector<2x8x1xf32> to vector<2x8x640xf32>
    %48 = arith.divf %31, %47 : vector<2x8x640xf32>
    %49 = vector.shape_cast %40 : vector<2x640xf32> to vector<2x1x640xf32>
    %50 = vector.broadcast %49 : vector<2x1x640xf32> to vector<2x8x640xf32>
    %51 = arith.mulf %50, %48 : vector<2x8x640xf32>
    %cst_27 = arith.constant dense<0.000000e+00> : vector<2x8xf32>
    %52 = vector.multi_reduction <add>, %51, %cst_27 [2] : vector<2x8x640xf32> to vector<2x8xf32>
    %cst_28 = arith.constant 7.000000e-02 : f32
    %53 = vector.broadcast %cst_28 : f32 to vector<2x8xf32>
    %54 = arith.divf %52, %53 : vector<2x8xf32>
    %cst_29 = arith.constant 0.000000e+00 : f32
    %55 = vector.broadcast %cst_29 : f32 to vector<2x128xf32>
    %c0_30 = arith.constant 0 : index
    %c0_31 = arith.constant 0 : index
    %56 = vector.load %arg9[%c0_30, %c0_31] : memref<2x128xf32, #tpu.memory_space<vmem>>, vector<2x128xf32>
    tpu.vector_store %arg9[%c0_30, %c0_31], %55 {strides = array<i32>} : memref<2x128xf32, #tpu.memory_space<vmem>>, vector<2x128xf32>,
    %c0_32 = arith.constant 0 : index
    %c0_33 = arith.constant 0 : index
    %57 = vector.load %arg9[%c0_32, %c0_33] : memref<2x128xf32, #tpu.memory_space<vmem>>, vector<2x8xf32>
    tpu.vector_store %arg9[%c0_32, %c0_33], %54 {strides = array<i32>} : memref<2x128xf32, #tpu.memory_space<vmem>>, vector<2x8xf32>,
    return
  }
}

</mosaic_0001>

<bundles_post_ra>
// kernel: tpu_custom_call.1
= control target key start
LH: loop header
LB: loop body
LE: loop exit
PB: predicated region body
PF: predicated region fallthrough
CT: control target
= control target key end

     0   :  { %15 = vsyncpa [#allocation3], 0  ;;  %s4710_s0 = inlined_call_operand.vmem [shape: bf16[16,640], index: 0, kind: input, shape index: {}]   ;;  %s4711_s1 = inlined_call_operand.vmem [shape: bf16[640,64], index: 1, kind: input, shape index: {}]   ;;  %s4712_s2 = inlined_call_operand.vmem [shape: f32[1,64], index: 2, kind: input, shape index: {}]   ;;  %s4713_s3 = inlined_call_operand.vmem [shape: bf16[64,640], index: 3, kind: input, shape index: {}]   ;;  %s4714_s4 = inlined_call_operand.vmem [shape: f32[1,640], index: 4, kind: input, shape index: {}]   ;;  %s4715_s5 = inlined_call_operand.vmem [shape: bf16[8,640], index: 5, kind: input, shape index: {}]   ;;  %s4716_s6 = inlined_call_operand.hbm [shape: bf16[640,640], index: 6, kind: input, shape index: {}]   ;;  %s4717_s7 = inlined_call_operand.hbm [shape: f32[16,640], index: 7, kind: output, shape index: {0}]   ;;  %s4718_s8 = inlined_call_operand.hbm [shape: f32[2,8,640], index: 8, kind: output, shape index: {1}]   ;;  %s4719_s9 = inlined_call_operand.hbm [shape: f32[2,128], index: 9, kind: output, shape index: {2}]  }
   0x1   :  { %16 = vsyncpa [#allocation4], 0 }
   0x2   :  { %17 = vsyncpa [#allocation7], 0  ;;  %s34_s11 = sshll.u32 %s4716_s6, 4  ;;  %s4173_s12 = smov [#allocation2]   ;;  %s35_s11 = int_to_ptr.hbm [resolvable:$true] %s34_s11 }
   0x3   :  { %s36_s13 = sshll.u32 %s4173_s12, 4  ;;  %s4174_s14 = smov 320   ;;  %s37_s13 = int_to_ptr.vmem [resolvable:$true] %s36_s13 }
   0x4   :  { %s4175_s15 = smov 20  }
   0x5   :  { %42 = dma.hbm_to_vmem [thread:$0]  %s35_s11, 25600, %s37_s13, [#allocation3], %s4174_s14, %s4174_s14, %s4175_s15  }
   0x6   :  { %4167 = dma.done.wait [#allocation3], 25600  }
   0x7   :  { %4168 = vsyncadd [#allocation3], 4294941696  ;;  %v3793_v0 = vld [vmem:[%s4711_s1 + $0x38] sm:$0xff]  ;;  %v3792_v4 = vld [vmem:[%s4711_s1 + $0x30] sm:$0xff]  ;;  %vm617_vm0 = vcmask 523264   ;;  %vm761_vm1 = vcmask 1040384  }
   0x8   :  { %v3809_v1 = vld [vmem:[%s4711_s1 + $0xb8] sm:$0xff]  ;;  %404 = vmatpush.bf16.msra.mxu0 %v3793_v0  ;;  %v3808_v5 = vld [vmem:[%s4711_s1 + $0xb0] sm:$0xff]  ;;  %v3791_v8 = vld [vmem:[%s4711_s1 + $0x28] sm:$0xff]  ;;  %vm2395_vm2 = vcmask 1041408   ;;  %vm2401_vm3 = vcmask 1041409   ;;  %vm2403_vm4 = vcmask 1042433  }
   0x9   :  { %v3817_v2 = vld [vmem:[%s4711_s1 + $0xf8] sm:$0xff]  ;;  %432 = vmatpush.bf16.msra.mxu2 %v3809_v1  ;;  %v3816_v6 = vld [vmem:[%s4711_s1 + $0xf0] sm:$0xff]  ;;  %v3807_v9 = vld [vmem:[%s4711_s1 + $0xa8] sm:$0xff]  ;;  %vm2397_vm5 = vcmask 1043459   ;;  %vm2399_vm6 = vcmask 1042432   ;;  %vm2405_vm7 = vcmask 1044484  }
   0xa   :  { %v3801_v3 = vld [vmem:[%s4711_s1 + $0x78] sm:$0xff]  ;;  %446 = vmatpush.bf16.msra.mxu3 %v3817_v2  ;;  %v3800_v7 = vld [vmem:[%s4711_s1 + $0x70] sm:$0xff]  ;;  %v3815_v10 = vld [vmem:[%s4711_s1 + $0xe8] sm:$0xff]  ;;  %vm2407_vm8 = vcmask 1043457   ;;  %s2683_s20 = sshll.u32 %s4718_s8, 4  ;;  %s4176_s21 = smov [#allocation6]   ;;  %s2684_s20 = int_to_ptr.hbm [resolvable:$true] %s2683_s20 }
   0xb   :  { %418 = vmatpush.bf16.msra.mxu1 %v3801_v3  ;;  %v3799_v11 = vld [vmem:[%s4711_s1 + $0x68] sm:$0xff]  ;;  %v3790_v12 = vld [vmem:[%s4711_s1 + $0x20] sm:$0xff]  ;;  %v3789_v16 = vld [vmem:[%s4711_s1 + $0x18] sm:$0xff]  ;;  %s2681_s6 = sshll.u32 %s4176_s21, 4  ;;  %s4177_s22 = smov 640   ;;  %s2682_s6 = int_to_ptr.vmem [resolvable:$true] %s2681_s6 }
   0xc   :  { %405 = vmatpush.bf16.msra.mxu0 %v3792_v4  ;;  %v3806_v13 = vld [vmem:[%s4711_s1 + $0xa0] sm:$0xff]  ;;  %v3805_v17 = vld [vmem:[%s4711_s1 + $0x98] sm:$0xff]  ;;  %v3788_v20 = vld [vmem:[%s4711_s1 + $0x10] sm:$0xff]  ;;  %s4178_s23 = smov 40   ;;  %s4179_s24 = smov [#allocation5]  }
   0xd   :  { %433 = vmatpush.bf16.msra.mxu2 %v3808_v5  ;;  %v3814_v14 = vld [vmem:[%s4711_s1 + $0xe0] sm:$0xff]  ;;  %v3813_v18 = vld [vmem:[%s4711_s1 + $0xd8] sm:$0xff]  ;;  %v3804_v21 = vld [vmem:[%s4711_s1 + $0x90] sm:$0xff]  ;;  %s2668_s25 = sshll.u32 %s4179_s24, 4  ;;  %s2670_s28 = sshll.u32 %s4717_s7, 4  ;;  %s2669_s25 = int_to_ptr.vmem [resolvable:$true] %s2668_s25  ;;  %s2671_s28 = int_to_ptr.hbm [resolvable:$true] %s2670_s28 }
   0xe   :  { %447 = vmatpush.bf16.msra.mxu3 %v3816_v6  ;;  %v3798_v15 = vld [vmem:[%s4711_s1 + $0x60] sm:$0xff]  ;;  %v3797_v19 = vld [vmem:[%s4711_s1 + $0x58] sm:$0xff]  ;;  %v3812_v22 = vld [vmem:[%s4711_s1 + $0xd0] sm:$0xff]  ;;  %s4182_s7 = smov [#allocation8]  }
   0xf   :  { %419 = vmatpush.bf16.msra.mxu1 %v3800_v7  ;;  %v3796_v23 = vld [vmem:[%s4711_s1 + $0x50] sm:$0xff]  ;;  %v3787_v24 = vld [vmem:[%s4711_s1 + $0x8] sm:$0xff]  ;;  %v3786_v28 = vld [vmem:[%s4711_s1] sm:$0xff]  ;;  %s2695_s8 = sshll.u32 %s4182_s7, 4  ;;  %s2696_s8 = int_to_ptr.vmem [resolvable:$true] %s2695_s8 }
  0x10   :  { %406 = vmatpush.bf16.msra.mxu0 %v3791_v8  ;;  %v3803_v25 = vld [vmem:[%s4711_s1 + $0x88] sm:$0xff]  ;;  %v3825_v29 = vld [vmem:[%s4711_s1 + $0x138] sm:$0xff]  ;;  %v3802_v30 = vld [vmem:[%s4711_s1 + $0x80] sm:$0xff] }
  0x11   :  { %434 = vmatpush.bf16.msra.mxu2 %v3807_v9  ;;  %v3811_v26 = vld [vmem:[%s4711_s1 + $0xc8] sm:$0xff]  ;;  %v3784_v32 = vld [vmem:[%s4710_s0 + $0x18] sm:$0xf0]  ;;  %v2718_v33 = vld [vmem:[%s4710_s0] sm:$0xf] }
  0x12   :  { %448 = vmatpush.bf16.msra.mxu3 %v3815_v10  ;;  %v3795_v27 = vld [vmem:[%s4711_s1 + $0x48] sm:$0xff]  ;;  %v3783_v34 = vld [vmem:[%s4710_s0 + $0x10] sm:$0xf0]  ;;  %v3810_v35 = vld [vmem:[%s4711_s1 + $0xc0] sm:$0xff] }
  0x13   :  { %420 = vmatpush.bf16.msra.mxu1 %v3799_v11  ;;  %v2726_v31 = vld [vmem:[%s4710_s0 + $0x8] sm:$0xf]  ;;  %v3782_v36 = vld [vmem:[%s4710_s0 + $0xc] sm:$0xf]  ;;  %v2728_v37 = vld [vmem:[%s4710_s0 + $0x1c] sm:$0xf0]  ;;  %v2719_v42 = vor.u32 %v3783_v34, %v2718_v33 }
  0x14   :  { %407 = vmatpush.bf16.msra.mxu0 %v3790_v12  ;;  %v3794_v38 = vld [vmem:[%s4711_s1 + $0x40] sm:$0xff]  ;;  %v2720_v40 = vld [vmem:[%s4710_s0 + $0x14] sm:$0xf0]  ;;  %v2727_v41 = vor.u32 %v3784_v32, %v2726_v31  ;;  %v2731_v43 = vor.u32 %v3782_v36, %v2728_v37  ;;  %v3824_v44 = vld [vmem:[%s4711_s1 + $0x130] sm:$0xff] }
  0x15   :  { %435 = vmatpush.bf16.msra.mxu2 %v3806_v13  ;;  %v3781_v39 = vld [vmem:[%s4710_s0 + $0x4] sm:$0xf]  ;;  %v3823_v46 = vld [vmem:[%s4711_s1 + $0x128] sm:$0xff]  ;;  %v3821_v48 = vld [vmem:[%s4711_s1 + $0x118] sm:$0xff] }
  0x16   :  { %449 = vmatpush.bf16.msra.mxu3 %v3814_v14  ;;  %v2723_v45 = vor.u32 %v3781_v39, %v2720_v40  ;;  %v3822_v47 = vld [vmem:[%s4711_s1 + $0x120] sm:$0xff]  ;;  %v3820_v49 = vld [vmem:[%s4711_s1 + $0x110] sm:$0xff]  ;;  %v3819_v50 = vld [vmem:[%s4711_s1 + $0x108] sm:$0xff] }
  0x17   :  { %421 = vmatpush.bf16.msra.mxu1 %v3798_v15  ;;  %v3818_v51 = vld [vmem:[%s4711_s1 + $0x100] sm:$0xff]  ;;  %v2734_v52 = vld [vmem:[%s4710_s0 + $0x10] sm:$0xf]  ;;  %v2958_v55 = vld [vmem:[%s4713_s3 + $0x78] sm:$0xf]  ;;  %s2697_s1 = sshll.u32 %s4719_s9, 4  ;;  %s2698_s1 = int_to_ptr.hbm [resolvable:$true] %s2697_s1 }
  0x18   :  { %408 = vmatpush.bf16.msra.mxu0 %v3789_v16  ;;  %v3785_v53 = vld [vmem:[%s4710_s0 + $0x20] sm:$0xf0]  ;;  %v3843_v56 = vld [vmem:[%s4713_s3 + $0x88] sm:$0xf0]  ;;  %v3841_v57 = vld [vmem:[%s4713_s3 + $0x7c] sm:$0xf] }
  0x19   :  { %436 = vmatpush.bf16.msra.mxu2 %v3805_v17  ;;  %v2735_v54 = vor.u32 %v3785_v53, %v2734_v52  ;;  %v2959_v58 = vor.u32 %v3843_v56, %v2958_v55  ;;  %v2960_v59 = vld [vmem:[%s4713_s3 + $0x8c] sm:$0xf0]  ;;  %v2966_v60 = vld [vmem:[%s4713_s3 + $0x80] sm:$0xf]  ;;  %v3844_v61 = vld [vmem:[%s4713_s3 + $0x90] sm:$0xf0] }
  0x1a   :  { %450 = vmatpush.bf16.msra.mxu3 %v3813_v18  ;;  %v2963_v62 = vor.u32 %v3841_v57, %v2960_v59  ;;  %v2967_v63 = vor.u32 %v3844_v61, %v2966_v60  ;;  %v2938_v0 = vld [vmem:[%s4713_s3 + $0x50] sm:$0xf]  ;;  %v3838_v1 = vld [vmem:[%s4713_s3 + $0x60] sm:$0xf0]  ;;  %v3836_v2 = vld [vmem:[%s4713_s3 + $0x54] sm:$0xf] }
  0x1b   :  { %422 = vmatpush.bf16.msra.mxu1 %v3797_v19  ;;  %v2939_v3 = vor.u32 %v3838_v1, %v2938_v0  ;;  %v2940_v4 = vld [vmem:[%s4713_s3 + $0x64] sm:$0xf0]  ;;  %v2946_v5 = vld [vmem:[%s4713_s3 + $0x58] sm:$0xf]  ;;  %v3839_v6 = vld [vmem:[%s4713_s3 + $0x68] sm:$0xf0] }
  0x1c   :  { %409 = vmatpush.bf16.msra.mxu0 %v3788_v20  ;;  %v2943_v7 = vor.u32 %v3836_v2, %v2940_v4  ;;  %v2947_v8 = vor.u32 %v3839_v6, %v2946_v5  ;;  %v2918_v9 = vld [vmem:[%s4713_s3 + $0x28] sm:$0xf]  ;;  %v3833_v10 = vld [vmem:[%s4713_s3 + $0x38] sm:$0xf0]  ;;  %v3831_v11 = vld [vmem:[%s4713_s3 + $0x2c] sm:$0xf] }
  0x1d   :  { %437 = vmatpush.bf16.msra.mxu2 %v3804_v21  ;;  %v2919_v12 = vor.u32 %v3833_v10, %v2918_v9  ;;  %v2920_v13 = vld [vmem:[%s4713_s3 + $0x3c] sm:$0xf0]  ;;  %v2926_v14 = vld [vmem:[%s4713_s3 + $0x30] sm:$0xf]  ;;  %v3834_v15 = vld [vmem:[%s4713_s3 + $0x40] sm:$0xf0] }
  0x1e   :  { %451 = vmatpush.bf16.msra.mxu3 %v3812_v22  ;;  %v2923_v16 = vor.u32 %v3831_v11, %v2920_v13  ;;  %v2927_v17 = vor.u32 %v3834_v15, %v2926_v14  ;;  %v2898_v18 = vld [vmem:[%s4713_s3] sm:$0xf]  ;;  %v3828_v19 = vld [vmem:[%s4713_s3 + $0x10] sm:$0xf0]  ;;  %v3826_v20 = vld [vmem:[%s4713_s3 + $0x4] sm:$0xf] }
  0x1f   :  { %423 = vmatpush.bf16.msra.mxu1 %v3796_v23  ;;  %v2899_v21 = vor.u32 %v3828_v19, %v2898_v18  ;;  %v2900_v22 = vld [vmem:[%s4713_s3 + $0x14] sm:$0xf0]  ;;  %v2906_v23 = vld [vmem:[%s4713_s3 + $0x8] sm:$0xf]  ;;  %v3845_v32 = vld [vmem:[%s4713_s3 + $0x98] sm:$0xf0] }
  0x20   :  { %410 = vmatpush.bf16.msra.mxu0 %v3787_v24  ;;  %v3829_v24 = vld [vmem:[%s4713_s3 + $0x18] sm:$0xf0]  ;;  %v2954_v36 = vld [vmem:[%s4713_s3 + $0x60] sm:$0xf]  ;;  %v3830_v52 = vld [vmem:[%s4713_s3 + $0x20] sm:$0xf0] }
  0x21   :  { %438 = vmatpush.bf16.msra.mxu2 %v3803_v25  ;;  %v2903_v25 = vor.u32 %v3826_v20, %v2900_v22  ;;  %v3837_v34 = vld [vmem:[%s4713_s3 + $0x5c] sm:$0xf]  ;;  %v3103_v0 = vld [vmem:[#allocation2 + $0xf0] sm:$0xf]  ;;  %v3878_v4 = vld [vmem:[#allocation2 + $0x100] sm:$0xf0] }
  0x22   :  { %452 = vmatpush.bf16.msra.mxu3 %v3811_v26  ;;  %v2907_v26 = vor.u32 %v3829_v24, %v2906_v23  ;;  %v3283_v5 = vld [vmem:[#allocation2 + $0x258] sm:$0xf]  ;;  %v3923_v6 = vld [vmem:[#allocation2 + $0x268] sm:$0xf0]  ;;  %v3104_v9 = vor.u32 %v3878_v4, %v3103_v0  ;;  %v3263_v10 = vld [vmem:[#allocation2 + $0x230] sm:$0xf] }
  0x23   :  { %424 = vmatpush.bf16.msra.mxu1 %v3795_v27  ;;  %v3918_v11 = vld [vmem:[#allocation2 + $0x240] sm:$0xf0]  ;;  %v3083_v13 = vld [vmem:[#allocation2 + $0xc8] sm:$0xf]  ;;  %v3873_v14 = vld [vmem:[#allocation2 + $0xd8] sm:$0xf0] }
  0x24   :  { %411 = vmatpush.bf16.msra.mxu0 %v3786_v28  ;;  %v3842_v28 = vld [vmem:[%s4713_s3 + $0x84] sm:$0xf]  ;;  %v3264_v15 = vor.u32 %v3918_v11, %v3263_v10  ;;  %v3913_v19 = vld [vmem:[#allocation2 + $0x218] sm:$0xf0]  ;;  %v3084_v20 = vor.u32 %v3873_v14, %v3083_v13  ;;  %v3063_v23 = vld [vmem:[#allocation2 + $0xa0] sm:$0xf] }
  0x25   :  { %439 = vmatpush.bf16.msra.mxu2 %v3802_v30  ;;  %v2974_v30 = vld [vmem:[%s4713_s3 + $0x88] sm:$0xf]  ;;  %v3868_v24 = vld [vmem:[#allocation2 + $0xb0] sm:$0xf0]  ;;  %v2983_v10 = vld [vmem:[#allocation2] sm:$0xf] }
  0x26   :  { %453 = vmatpush.bf16.msra.mxu3 %v3810_v35  ;;  %v2975_v33 = vor.u32 %v3845_v32, %v2974_v30  ;;  %v2948_v35 = vld [vmem:[%s4713_s3 + $0x6c] sm:$0xf0]  ;;  %v3603_v30 = vld [vmem:[#allocation2 + $0x4d8] sm:$0xf]  ;;  %v4003_v32 = vld [vmem:[#allocation2 + $0x4e8] sm:$0xf0] }
  0x27   :  { %425 = vmatpush.bf16.msra.mxu1 %v3794_v38  ;;  %412 = vmatmul.bf16.vlgmr.msra.gmra.mxu0 %v2719_v42  ;;  %v2951_v37 = vor.u32 %v3837_v34, %v2948_v35  ;;  %v3840_v38 = vld [vmem:[%s4713_s3 + $0x70] sm:$0xf0]  ;;  %v2928_v42 = vld [vmem:[%s4713_s3 + $0x44] sm:$0xf0]  ;;  %v3363_v13 = vld [vmem:[#allocation2 + $0x2f8] sm:$0xf] }
  0x28   :  { %460 = vmatpush.bf16.msrb.mxu0 %v3825_v29  ;;  %440 = vmatmul.bf16.vlgmr.msra.gmra.mxu2 %v2727_v41  ;;  %v2968_v29 = vld [vmem:[%s4713_s3 + $0x94] sm:$0xf0]  ;;  %v2955_v40 = vor.u32 %v3840_v38, %v2954_v36  ;;  %v3832_v41 = vld [vmem:[%s4713_s3 + $0x34] sm:$0xf]  ;;  %v3863_v38 = vld [vmem:[#allocation2 + $0x88] sm:$0xf0] }
  0x29   :  { %454 = vmatmul.bf16.vlgmr.msra.gmra.mxu3 %v2731_v43  ;;  %639 = vmatpush.bf16.msrb.mxu2 %v2963_v62  ;;  %v2971_v31 = vor.u32 %v3842_v28, %v2968_v29  ;;  %v2934_v43 = vld [vmem:[%s4713_s3 + $0x38] sm:$0xf]  ;;  %v3963_v29 = vld [vmem:[#allocation2 + $0x3a8] sm:$0xf0]  ;;  %v3908_v34 = vld [vmem:[#allocation2 + $0x1f0] sm:$0xf0] }
  0x2a   :  { %426 = vmatmul.bf16.vlgmr.msra.gmra.mxu1 %v2723_v45  ;;  %653 = vmatpush.bf16.msrb.mxu3 %v2967_v63  ;;  %v4056_v45 = vld [vmem:[%s4712_s2] ss:$0 sm:$0xff]  ;;  %v3123_v62 = vld [vmem:[#allocation2 + $0x118] sm:$0xf]  ;;  %v3883_v63 = vld [vmem:[#allocation2 + $0x128] sm:$0xf0] }
  0x2b   :  { %625 = vmatpush.bf16.msrb.mxu1 %v2959_v58  ;;  %v3443_v28 = vld [vmem:[#allocation2 + $0x398] sm:$0xf]  ;;  %v3848_v11 = vld [vmem:[#allocation2 + $0x10] sm:$0xf0]  ;;  %v3943_v14 = vld [vmem:[#allocation2 + $0x308] sm:$0xf0] }
  0x2c   :  { %461 = vmatpush.bf16.msrb.mxu0 %v3824_v44  ;;  %v3835_v44 = vld [vmem:[%s4713_s3 + $0x48] sm:$0xf0] }
  0x2d   :  { %640 = vmatpush.bf16.msrb.mxu2 %v2943_v7 }
  0x2e   :  { %654 = vmatpush.bf16.msrb.mxu3 %v2947_v8  ;;  %v3284_v8 = vor.u32 %v3923_v6, %v3283_v5  ;;  %v3543_v5 = vld [vmem:[#allocation2 + $0x460] sm:$0xf] }
  0x2f   :  { %626 = vmatpush.bf16.msrb.mxu1 %v2939_v3  ;;  %v3124_v3 = vor.u32 %v3883_v63, %v3123_v62  ;;  %v3003_v62 = vld [vmem:[#allocation2 + $0x28] sm:$0xf]  ;;  %v3853_v63 = vld [vmem:[#allocation2 + $0x38] sm:$0xf0] }
  0x30   :  { %462 = vmatpush.bf16.msrb.mxu0 %v3823_v46  ;;  %v2931_v46 = vor.u32 %v3832_v41, %v2928_v42  ;;  %v3423_v41 = vld [vmem:[#allocation2 + $0x370] sm:$0xf]  ;;  %v3958_v42 = vld [vmem:[#allocation2 + $0x380] sm:$0xf0]  ;;  %v3004_v6 = vor.u32 %v3853_v63, %v3003_v62 }
  0x31   :  { %641 = vmatpush.bf16.msrb.mxu2 %v2923_v16 }
  0x32   :  { %655 = vmatpush.bf16.msrb.mxu3 %v2927_v17  ;;  %v3243_v17 = vld [vmem:[#allocation2 + $0x208] sm:$0xf] }
  0x33   :  { %627 = vmatpush.bf16.msrb.mxu1 %v2919_v12 }
  0x34   :  { %463 = vmatpush.bf16.msrb.mxu0 %v3822_v47 }
  0x35   :  { %642 = vmatpush.bf16.msrb.mxu2 %v2903_v25  ;;  %v3244_v25 = vor.u32 %v3913_v19, %v3243_v17  ;;  %v4043_v17 = vld [vmem:[#allocation2 + $0x628] sm:$0xf0]  ;;  %v2984_v19 = vor.u32 %v3848_v11, %v2983_v10  ;;  %v3961_v11 = vld [vmem:[#allocation2 + $0x39c] sm:$0xf] }
  0x36   :  { %656 = vmatpush.bf16.msrb.mxu3 %v2907_v26  ;;  %v4023_v10 = vld [vmem:[#allocation2 + $0x588] sm:$0xf0] }
  0x37   :  { %628 = vmatpush.bf16.msrb.mxu1 %v2899_v21 }
  0x38   :  { %464 = vmatpush.bf16.msrb.mxu0 %v3821_v48  ;;  %v2935_v48 = vor.u32 %v3835_v44, %v2934_v43  ;;  %v3604_v43 = vor.u32 %v4003_v32, %v3603_v30  ;;  %v4038_v32 = vld [vmem:[#allocation2 + $0x600] sm:$0xf0] }
  0x39   :  { %681 = vmatpush.bf16.msra.mxu2 %v2975_v33  ;;  %v3223_v33 = vld [vmem:[#allocation2 + $0x1e0] sm:$0xf] }
  0x3a   :  { %2052 = vmatpush.bf16.msra.mxu3 %v3124_v3  ;;  %v3224_v44 = vor.u32 %v3908_v34, %v3223_v33  ;;  %v3143_v34 = vld [vmem:[#allocation2 + $0x140] sm:$0xf] }
  0x3b   :  { %667 = vmatpush.bf16.msra.mxu1 %v2971_v31  ;;  %v3064_v31 = vor.u32 %v3868_v24, %v3063_v23  ;;  %v3938_v23 = vld [vmem:[#allocation2 + $0x2e0] sm:$0xf0] }
  0x3c   :  { %465 = vmatpush.bf16.msrb.mxu0 %v3820_v49  ;;  %v3827_v49 = vld [vmem:[%s4713_s3 + $0xc] sm:$0xf] }
  0x3d   :  { %682 = vmatpush.bf16.msra.mxu2 %v2955_v40 }
  0x3e   :  { %2053 = vmatpush.bf16.msra.mxu3 %v3104_v9  ;;  %v3893_v9 = vld [vmem:[#allocation2 + $0x178] sm:$0xf0] }
  0x3f   :  { %668 = vmatpush.bf16.msra.mxu1 %v2951_v37  ;;  %v3043_v37 = vld [vmem:[#allocation2 + $0x78] sm:$0xf] }
  0x40   :  { %466 = vmatpush.bf16.msrb.mxu0 %v3819_v50  ;;  %v2908_v50 = vld [vmem:[%s4713_s3 + $0x1c] sm:$0xf0] }
  0x41   :  { %v2911_v55 = vor.u32 %v3827_v49, %v2908_v50  ;;  %683 = vmatpush.bf16.msra.mxu2 %v2935_v48  ;;  %v3203_v48 = vld [vmem:[#allocation2 + $0x1b8] sm:$0xf]  ;;  %v3903_v49 = vld [vmem:[#allocation2 + $0x1c8] sm:$0xf0]  ;;  %v3023_v50 = vld [vmem:[#allocation2 + $0x50] sm:$0xf] }
  0x42   :  { %2054 = vmatpush.bf16.msra.mxu3 %v3084_v20  ;;  %v3364_v20 = vor.u32 %v3943_v14, %v3363_v13  ;;  %v3445_v13 = vld [vmem:[#allocation2 + $0x3ac] sm:$0xf0] }
  0x43   :  { %669 = vmatpush.bf16.msra.mxu1 %v2931_v46  ;;  %v3044_v46 = vor.u32 %v3863_v38, %v3043_v37  ;;  %v3928_v38 = vld [vmem:[#allocation2 + $0x290] sm:$0xf0]  ;;  %v3448_v14 = vor.u32 %v3961_v11, %v3445_v13 }
  0x44   :  { %467 = vmatpush.bf16.msrb.mxu0 %v3818_v51  ;;  %v2914_v51 = vld [vmem:[%s4713_s3 + $0x10] sm:$0xf] }
  0x45   :  { %v2915_v57 = vor.u32 %v3830_v52, %v2914_v51  ;;  %v3858_v51 = vld [vmem:[#allocation2 + $0x60] sm:$0xf0]  ;;  %v3424_v52 = vor.u32 %v3958_v42, %v3423_v41 }
  0x46   :  { %2055 = vmatpush.bf16.msra.mxu3 %v3064_v31  ;;  %v3743_v31 = vld [vmem:[#allocation2 + $0x5f0] sm:$0xf] }
  0x47   :  { %468 = vmatmul.bf16.vlgmr.msrb.gmra.mxu0 %v2735_v54  ;;  %670 = vmatpush.bf16.msra.mxu1 %v2911_v55  ;;  %v3744_v33 = vor.u32 %v4038_v32, %v3743_v31  ;;  %v3205_v31 = vld [vmem:[#allocation2 + $0x1cc] sm:$0xf0] }
  0x48   :  { %684 = vmatpush.bf16.msra.mxu2 %v2915_v57  ;;  %2065 = vmatpush.bf16.msra.mxu0 %v3284_v8  ;;  %v3563_v57 = vld [vmem:[#allocation2 + $0x488] sm:$0xf] }
  0x49   :  { %v3163_v8 = vld [vmem:[#allocation2 + $0x168] sm:$0xf] }
  0x4a   :  { %2056 = vmatpush.bf16.msra.mxu3 %v3044_v46 }
  0x4c   :  { %2066 = vmatpush.bf16.msra.mxu0 %v3264_v15 }
  0x50   :  { %2067 = vmatpush.bf16.msra.mxu0 %v3244_v25  ;;  %v3323_v25 = vld [vmem:[#allocation2 + $0x2a8] sm:$0xf] }
  0x54   :  { %2068 = vmatpush.bf16.msra.mxu0 %v3224_v44  ;;  %v3285_v44 = vld [vmem:[#allocation2 + $0x26c] sm:$0xf0] }
  0xa4   :  { %v413_v27 = vpop.f32.mrf.mxu0 }
  0xa5   :  { %v414_v54 = vadd.f32 %v4056_v45, %v413_v27 }
  0xa7   :  { %v427_v39 = vpop.f32.mrf.mxu1 }
  0xa8   :  { %v428_v60 = vadd.f32 %v427_v39, %v414_v54  ;;  %v3444_v39 = vor.u32 %v3963_v29, %v3443_v28  ;;  %v3953_v54 = vld [vmem:[#allocation2 + $0x358] sm:$0xf0]  ;;  %v3523_v28 = vld [vmem:[#allocation2 + $0x438] sm:$0xf]  ;;  %v3983_v29 = vld [vmem:[#allocation2 + $0x448] sm:$0xf0] }
  0xa9   :  { %v3524_v30 = vor.u32 %v3983_v29, %v3523_v28  ;;  %v3045_v28 = vld [vmem:[#allocation2 + $0x8c] sm:$0xf0]  ;;  %v3901_v29 = vld [vmem:[#allocation2 + $0x1bc] sm:$0xf] }
  0xaa   :  { %v3208_v32 = vor.u32 %v3901_v29, %v3205_v31 }
  0xab   :  { %v441_v47 = vpop.f32.mrf.mxu2 }
  0xac   :  { %v415_v53 = vpop.f32.mrf.mxu0  ;;  %v455_v56 = vpop.f32.mrf.mxu3  ;;  %v442_v7 = vadd.f32 %v441_v47, %v428_v60  ;;  %v3998_v47 = vld [vmem:[#allocation2 + $0x4c0] sm:$0xf0]  ;;  %v3183_v60 = vld [vmem:[#allocation2 + $0x190] sm:$0xf] }
  0xad   :  { %v416_v58 = vadd.f32 %v4056_v45, %v415_v53  ;;  %v3583_v45 = vld [vmem:[#allocation2 + $0x4b0] sm:$0xf]  ;;  %v3403_v53 = vld [vmem:[#allocation2 + $0x348] sm:$0xf] }
  0xae   :  { %v456_v18 = vadd.f32 %v455_v56, %v442_v7  ;;  %v3584_v55 = vor.u32 %v3998_v47, %v3583_v45  ;;  %v3204_v56 = vor.u32 %v3903_v49, %v3203_v48  ;;  %v3404_v0 = vor.u32 %v3953_v54, %v3403_v53  ;;  %v3988_v7 = vld [vmem:[#allocation2 + $0x470] sm:$0xf0]  ;;  %v3503_v45 = vld [vmem:[#allocation2 + $0x410] sm:$0xf]  ;;  %v3978_v47 = vld [vmem:[#allocation2 + $0x420] sm:$0xf0] }
  0xaf   :  { %v429_v59 = vpop.f32.mrf.mxu1  ;;  %v3544_v15 = vor.u32 %v3988_v7, %v3543_v5  ;;  %v3723_v48 = vld [vmem:[#allocation2 + $0x5c8] sm:$0xf]  ;;  %v4033_v49 = vld [vmem:[#allocation2 + $0x5d8] sm:$0xf0]  ;;  %v3916_v54 = vld [vmem:[#allocation2 + $0x234] sm:$0xf] }
  0xb0   :  { %v430_v61 = vadd.f32 %v429_v59, %v416_v58  ;;  %v3024_v58 = vor.u32 %v3858_v51, %v3023_v50  ;;  %v3993_v59 = vld [vmem:[#allocation2 + $0x498] sm:$0xf0]  ;;  %2069 = vmatpush.bf16.msra.mxu0 %v3204_v56  ;;  %v3504_v50 = vor.u32 %v3978_v47, %v3503_v45  ;;  %v3724_v51 = vor.u32 %v4033_v49, %v3723_v48  ;;  %v3105_v53 = vld [vmem:[#allocation2 + $0x104] sm:$0xf0]  ;;  %v3463_v5 = vld [vmem:[#allocation2 + $0x3c0] sm:$0xf] }
  0xb1   :  { %v3564_v3 = vor.u32 %v3993_v59, %v3563_v57  ;;  %v3265_v56 = vld [vmem:[#allocation2 + $0x244] sm:$0xf0]  ;;  %v3973_v59 = vld [vmem:[#allocation2 + $0x3f8] sm:$0xf0]  ;;  %v3623_v45 = vld [vmem:[#allocation2 + $0x500] sm:$0xf] }
  0xb2   :  { %2057 = vmatpush.bf16.msra.mxu3 %v3024_v58  ;;  %v3483_v57 = vld [vmem:[#allocation2 + $0x3e8] sm:$0xf]  ;;  %v3268_v58 = vor.u32 %v3916_v54, %v3265_v56  ;;  %v3946_v47 = vld [vmem:[#allocation2 + $0x324] sm:$0xf]  ;;  %v3891_v54 = vld [vmem:[#allocation2 + $0x16c] sm:$0xf] }
  0xb3   :  { %v443_v1 = vpop.f32.mrf.mxu2  ;;  %v3484_v62 = vor.u32 %v3973_v59, %v3483_v57  ;;  %v4524_v48 = vld [vmem:[%s4714_s4] sm:$0x1f]  ;;  %v3365_v59 = vld [vmem:[#allocation2 + $0x30c] sm:$0xf0] }
  0xb4   :  { %v444_v12 = vadd.f32 %v443_v1, %v430_v61  ;;  %v457_v16 = vpop.f32.mrf.mxu3  ;;  %v3898_v61 = vld [vmem:[#allocation2 + $0x1a0] sm:$0xf0]  ;;  %v3383_v1 = vld [vmem:[#allocation2 + $0x320] sm:$0xf]  ;;  %v505_v11 = vperm.slane %v4524_v48, 2 }
  0xb5   :  { %v3184_v4 = vor.u32 %v3898_v61, %v3183_v60  ;;  %v3703_v60 = vld [vmem:[#allocation2 + $0x5a0] sm:$0xf]  ;;  %v4028_v61 = vld [vmem:[#allocation2 + $0x5b0] sm:$0xf0] }
  0xb6   :  { %v458_v21 = vadd.f32 %v457_v16, %v444_v12  ;;  %v3763_v16 = vld [vmem:[#allocation2 + $0x618] sm:$0xf]  ;;  %2058 = vmatpush.bf16.msra.mxu3 %v3004_v6  ;;  %v3704_v63 = vor.u32 %v4028_v61, %v3703_v60  ;;  %v3968_v6 = vld [vmem:[#allocation2 + $0x3d0] sm:$0xf0]  ;;  %v3165_v56 = vld [vmem:[#allocation2 + $0x17c] sm:$0xf0] }
  0xb7   :  { %2070 = vmatpush.bf16.msra.mxu0 %v3184_v4  ;;  %v3245_v4 = vld [vmem:[#allocation2 + $0x21c] sm:$0xf0]  ;;  %v3168_v57 = vor.u32 %v3891_v54, %v3165_v56  ;;  %v503_v60 = vperm.slane %v4524_v48, 0  ;;  %v3605_v54 = vld [vmem:[#allocation2 + $0x4ec] sm:$0xf0] }
  0xba   :  { %2059 = vmatpush.bf16.msra.mxu3 %v2984_v19  ;;  %v3225_v19 = vld [vmem:[#allocation2 + $0x1f4] sm:$0xf0] }
  0xc4   :  { %v469_v2 = vpop.f32.mrf.mxu0 }
  0xc5   :  { %v470_v22 = vadd.f32 %v469_v2, %v456_v18  ;;  %v3948_v2 = vld [vmem:[#allocation2 + $0x330] sm:$0xf0]  ;;  %v3164_v18 = vor.u32 %v3893_v9, %v3163_v8  ;;  %v3464_v8 = vor.u32 %v3968_v6, %v3463_v5  ;;  %v3683_v9 = vld [vmem:[#allocation2 + $0x578] sm:$0xf]  ;;  %v3345_v6 = vld [vmem:[#allocation2 + $0x2e4] sm:$0xf0] }
  0xc6   :  { %v3384_v12 = vor.u32 %v3948_v2, %v3383_v1  ;;  %v3085_v1 = vld [vmem:[#allocation2 + $0xdc] sm:$0xf0]  ;;  %v3911_v2 = vld [vmem:[#allocation2 + $0x20c] sm:$0xf]  ;;  %v3936_v5 = vld [vmem:[#allocation2 + $0x2d4] sm:$0xf] }
  0xc7   :  { %v474_v35 = vmax.f32 %v470_v22, 0.0  ;;  %v3343_v22 = vld [vmem:[#allocation2 + $0x2d0] sm:$0xf]  ;;  %2071 = vmatpush.bf16.msra.mxu0 %v3164_v18  ;;  %v3248_v7 = vor.u32 %v3911_v2, %v3245_v4  ;;  %v3145_v2 = vld [vmem:[#allocation2 + $0x154] sm:$0xf0] }
  0xc8   :  { %v3344_v24 = vor.u32 %v3938_v23, %v3343_v22  ;;  %v4018_v22 = vld [vmem:[#allocation2 + $0x560] sm:$0xf0]  ;;  %v3956_v23 = vld [vmem:[#allocation2 + $0x374] sm:$0xf] }
  0xcc   :  { %v471_v26 = vpop.f32.mrf.mxu0 }
  0xcd   :  { %v472_v27 = vadd.f32 %v471_v26, %v458_v21  ;;  %v3764_v21 = vor.u32 %v4043_v17, %v3763_v16  ;;  %v3933_v26 = vld [vmem:[#allocation2 + $0x2b8] sm:$0xf0]  ;;  %v3065_v16 = vld [vmem:[#allocation2 + $0xb4] sm:$0xf0]  ;;  %v3906_v17 = vld [vmem:[#allocation2 + $0x1e4] sm:$0xf] }
  0xcf   :  { %v475_v36 = vmax.f32 %v472_v27, 0.0  ;;  %v3324_v27 = vor.u32 %v3933_v26, %v3323_v25  ;;  %v3425_v25 = vld [vmem:[#allocation2 + $0x384] sm:$0xf0] }
  0xd0   :  { %v3428_v26 = vor.u32 %v3956_v23, %v3425_v25  ;;  %v3305_v25 = vld [vmem:[#allocation2 + $0x294] sm:$0xf0] }
  0xd1   :  { %v4509_v40 = vpack.c.bf16 %v475_v36, %v474_v35  ;;  %v3888_v35 = vld [vmem:[#allocation2 + $0x150] sm:$0xf0]  ;;  %v3303_v36 = vld [vmem:[#allocation2 + $0x280] sm:$0xf] }
  0xd2   :  { %v3144_v37 = vor.u32 %v3888_v35, %v3143_v34  ;;  %v3304_v41 = vor.u32 %v3928_v38, %v3303_v36  ;;  %v4013_v34 = vld [vmem:[#allocation2 + $0x538] sm:$0xf0]  ;;  %v3951_v35 = vld [vmem:[#allocation2 + $0x34c] sm:$0xf] }
  0xd3   :  { %2976 = vmatmul.msk.bf16.vlgmr.msrb.gmra.mxu1 %vm617_vm0, %v4509_v40  ;;  %2977 = vmatmul.msk.bf16.vlgmr.msrb.gmra.mxu2 %vm617_vm0, %v4509_v40 }
  0xd4   :  { %2978 = vmatmul.msk.bf16.vlgmr.msrb.gmra.mxu3 %vm617_vm0, %v4509_v40  ;;  %2078 = vmatpush.bf16.msrb.mxu1 %v3444_v39  ;;  %v3881_v39 = vld [vmem:[#allocation2 + $0x11c] sm:$0xf] }
  0xd5   :  { %2091 = vmatpush.bf16.msrb.mxu2 %v3604_v43  ;;  %2104 = vmatpush.bf16.msrb.mxu3 %v3764_v21  ;;  %v3921_v43 = vld [vmem:[#allocation2 + $0x25c] sm:$0xf]  ;;  %v3663_v21 = vld [vmem:[#allocation2 + $0x550] sm:$0xf] }
  0xd6   :  { %2072 = vmatpush.bf16.msra.mxu0 %v3144_v37  ;;  %v3288_v46 = vor.u32 %v3921_v43, %v3285_v44  ;;  %v3405_v37 = vld [vmem:[#allocation2 + $0x35c] sm:$0xf0]  ;;  %v3185_v43 = vld [vmem:[#allocation2 + $0x1a4] sm:$0xf0] }
  0xd7   :  { %v3408_v38 = vor.u32 %v3951_v35, %v3405_v37 }
  0xd8   :  { %2079 = vmatpush.bf16.msrb.mxu1 %v3424_v52  ;;  %v3876_v52 = vld [vmem:[#allocation2 + $0xf4] sm:$0xf] }
  0xd9   :  { %2092 = vmatpush.bf16.msrb.mxu2 %v3584_v55  ;;  %2105 = vmatpush.bf16.msrb.mxu3 %v3744_v33  ;;  %v3108_v55 = vor.u32 %v3876_v52, %v3105_v53  ;;  %v3643_v33 = vld [vmem:[#allocation2 + $0x528] sm:$0xf]  ;;  %v3851_v52 = vld [vmem:[#allocation2 + $0x2c] sm:$0xf]  ;;  %v3005_v53 = vld [vmem:[#allocation2 + $0x3c] sm:$0xf0] }
  0xda   :  { %v3644_v36 = vor.u32 %v4013_v34, %v3643_v33  ;;  %v506_v33 = vperm.slane %v4524_v48, 3 }
  0xdc   :  { %2080 = vmatpush.bf16.msrb.mxu1 %v3404_v0  ;;  %v3871_v0 = vld [vmem:[#allocation2 + $0xcc] sm:$0xf] }
  0xdd   :  { %2093 = vmatpush.bf16.msrb.mxu2 %v3564_v3  ;;  %2106 = vmatpush.bf16.msrb.mxu3 %v3724_v51  ;;  %v3088_v3 = vor.u32 %v3871_v0, %v3085_v1  ;;  %v3886_v0 = vld [vmem:[#allocation2 + $0x144] sm:$0xf] }
  0xe0   :  { %2081 = vmatpush.bf16.msrb.mxu1 %v3384_v12  ;;  %v3684_v12 = vor.u32 %v4023_v10, %v3683_v9  ;;  %v504_v10 = vperm.slane %v4524_v48, 1 }
  0xe1   :  { %2094 = vmatpush.bf16.msrb.mxu2 %v3544_v15  ;;  %2107 = vmatpush.bf16.msrb.mxu3 %v3704_v63  ;;  %v3866_v15 = vld [vmem:[#allocation2 + $0xa4] sm:$0xf]  ;;  %v2985_v63 = vld [vmem:[#allocation2 + $0x14] sm:$0xf0] }
  0xe2   :  { %v3068_v18 = vor.u32 %v3866_v15, %v3065_v16 }
  0xe3   :  { %2979 = vmatmul.msk.bf16.vlgmr.msra.gmra.mxu1 %vm617_vm0, %v4509_v40  ;;  %2980 = vmatmul.msk.bf16.vlgmr.msra.gmra.mxu2 %vm617_vm0, %v4509_v40  ;;  %v3125_v40 = vld [vmem:[#allocation2 + $0x12c] sm:$0xf0] }
  0xe4   :  { %2082 = vmatpush.bf16.msrb.mxu1 %v3364_v20  ;;  %v3128_v42 = vor.u32 %v3881_v39, %v3125_v40  ;;  %v3228_v20 = vor.u32 %v3906_v17, %v3225_v19  ;;  %v3856_v39 = vld [vmem:[#allocation2 + $0x54] sm:$0xf]  ;;  %v3025_v40 = vld [vmem:[#allocation2 + $0x64] sm:$0xf0] }
  0xe5   :  { %2095 = vmatpush.bf16.msrb.mxu2 %v3524_v30  ;;  %2108 = vmatpush.bf16.msrb.mxu3 %v3684_v12  ;;  %v3931_v12 = vld [vmem:[#allocation2 + $0x2ac] sm:$0xf] }
  0xe6   :  { %2117 = vmatpush.bf16.msrb.mxu0 %v3128_v42  ;;  %v3896_v42 = vld [vmem:[#allocation2 + $0x194] sm:$0xf] }
  0xe7   :  { %v3188_v44 = vor.u32 %v3896_v42, %v3185_v43 }
  0xe8   :  { %2083 = vmatpush.bf16.msrb.mxu1 %v3344_v24  ;;  %v3664_v24 = vor.u32 %v4018_v22, %v3663_v21  ;;  %v3926_v21 = vld [vmem:[#allocation2 + $0x284] sm:$0xf] }
  0xe9   :  { %2096 = vmatpush.bf16.msrb.mxu2 %v3504_v50  ;;  %v3385_v50 = vld [vmem:[#allocation2 + $0x334] sm:$0xf0] }
  0xea   :  { %2118 = vmatpush.bf16.msrb.mxu0 %v3108_v55  ;;  %2109 = vmatpush.bf16.msrb.mxu3 %v3664_v24  ;;  %v3388_v51 = vor.u32 %v3946_v47, %v3385_v50  ;;  %v3008_v55 = vor.u32 %v3851_v52, %v3005_v53  ;;  %v507_v47 = vperm.slane %v4524_v48, 4 }
  0xec   :  { %2084 = vmatpush.bf16.msrb.mxu1 %v3324_v27  ;;  %v3861_v27 = vld [vmem:[#allocation2 + $0x7c] sm:$0xf] }
  0xed   :  { %2097 = vmatpush.bf16.msrb.mxu2 %v3484_v62  ;;  %v3048_v30 = vor.u32 %v3861_v27, %v3045_v28  ;;  %v3846_v62 = vld [vmem:[#allocation2 + $0x4] sm:$0xf]  ;;  %v3308_v27 = vor.u32 %v3926_v21, %v3305_v25  ;;  %v3565_v25 = vld [vmem:[#allocation2 + $0x49c] sm:$0xf0] }
  0xee   :  { %2119 = vmatpush.bf16.msrb.mxu0 %v3088_v3  ;;  %2110 = vmatpush.bf16.msrb.mxu3 %v3644_v36  ;;  %v2988_v1 = vor.u32 %v3846_v62, %v2985_v63  ;;  %v3148_v3 = vor.u32 %v3886_v0, %v3145_v2 }
  0xf0   :  { %2085 = vmatpush.bf16.msrb.mxu1 %v3304_v41  ;;  %v3028_v41 = vor.u32 %v3856_v39, %v3025_v40 }
  0xf1   :  { %2098 = vmatpush.bf16.msrb.mxu2 %v3464_v8  ;;  %v3348_v8 = vor.u32 %v3936_v5, %v3345_v6  ;;  %v3585_v5 = vld [vmem:[#allocation2 + $0x4c4] sm:$0xf0] }
  0xf2   :  { %2120 = vmatpush.bf16.msrb.mxu0 %v3068_v18 }
  0xf4   :  { %2130 = vmatpush.bf16.msra.mxu1 %v3288_v46  ;;  %v4008_v46 = vld [vmem:[#allocation2 + $0x510] sm:$0xf0] }
  0xf5   :  { %2143 = vmatpush.bf16.msra.mxu2 %v3448_v14  ;;  %v3624_v49 = vor.u32 %v4008_v46, %v3623_v45  ;;  %v3325_v14 = vld [vmem:[#allocation2 + $0x2bc] sm:$0xf0] }
  0xf6   :  { %2121 = vmatpush.bf16.msrb.mxu0 %v3048_v30  ;;  %v3328_v16 = vor.u32 %v3931_v12, %v3325_v14 }
  0xf7   :  { %2111 = vmatpush.bf16.msrb.mxu3 %v3624_v49  ;;  %v4001_v49 = vld [vmem:[#allocation2 + $0x4dc] sm:$0xf] }
  0xf8   :  { %2131 = vmatpush.bf16.msra.mxu1 %v3268_v58  ;;  %v3941_v58 = vld [vmem:[#allocation2 + $0x2fc] sm:$0xf]  ;;  %v3608_v63 = vor.u32 %v4001_v49, %v3605_v54  ;;  %v3091_v54 = vld [vmem:[#allocation2 + $0xd0] sm:$0xf] }
  0xf9   :  { %2144 = vmatpush.bf16.msra.mxu2 %v3428_v26  ;;  %v3368_v61 = vor.u32 %v3941_v58, %v3365_v59 }
  0xfa   :  { %2122 = vmatpush.bf16.msrb.mxu0 %v3028_v41 }
  0xfc   :  { %2132 = vmatpush.bf16.msra.mxu1 %v3248_v7 }
  0xfd   :  { %2145 = vmatpush.bf16.msra.mxu2 %v3408_v38 }
  0xfe   :  { %2123 = vmatpush.bf16.msrb.mxu0 %v3008_v55 }
 0x100   :  { %2133 = vmatpush.bf16.msra.mxu1 %v3228_v20 }
 0x101   :  { %2146 = vmatpush.bf16.msra.mxu2 %v3388_v51 }
 0x102   :  { %2124 = vmatpush.bf16.msrb.mxu0 %v2988_v1 }
 0x104   :  { %2134 = vmatpush.bf16.msra.mxu1 %v3208_v32 }
 0x105   :  { %2147 = vmatpush.bf16.msra.mxu2 %v3368_v61 }
 0x108   :  { %2135 = vmatpush.bf16.msra.mxu1 %v3188_v44 }
 0x109   :  { %2148 = vmatpush.bf16.msra.mxu2 %v3348_v8 }
 0x10c   :  { %2136 = vmatpush.bf16.msra.mxu1 %v3168_v57 }
 0x10d   :  { %2149 = vmatpush.bf16.msra.mxu2 %v3328_v16 }
 0x110   :  { %2137 = vmatpush.bf16.msra.mxu1 %v3148_v3 }
 0x111   :  { %2150 = vmatpush.bf16.msra.mxu2 %v3308_v27 }
 0x150   :  { %v630_v4 = vpop.f32.mrf.mxu1 }
 0x151   :  { %v631_v7 = vadd.f32 %v630_v4, %v503_v60  ;;  %v3996_v4 = vld [vmem:[#allocation2 + $0x4b4] sm:$0xf] }
 0x153   :  { %691 = vst [vmem:[#allocation5] sm:$0xff] %v631_v7  ;;  %v701_v9 = vrot.slane %v631_v7, 4 }
 0x155   :  { %v702_v13 = vmax.f32 %v631_v7, %v701_v9 }
 0x156   :  { %v644_v15 = vpop.f32.mrf.mxu2 }
 0x157   :  { %v645_v17 = vadd.f32 %v644_v15, %v504_v10  ;;  %v658_v18 = vpop.f32.mrf.mxu3  ;;  %v703_v22 = vrot.slane %v702_v13, 2  ;;  %v3765_v15 = vld [vmem:[#allocation2 + $0x62c] sm:$0xf0] }
 0x158   :  { %v659_v19 = vadd.f32 %v658_v18, %v505_v11  ;;  %v632_v20 = vpop.f32.mrf.mxu1  ;;  %v3131_v18 = vld [vmem:[#allocation2 + $0x120] sm:$0xf] }
 0x159   :  { %692 = vst [vmem:[#allocation5 + $0x8] sm:$0xff] %v645_v17  ;;  %v707_v23 = vrot.slane %v645_v17, 4  ;;  %v633_v24 = vadd.f32 %v632_v20, %v503_v60  ;;  %v704_v31 = vmax.f32 %v702_v13, %v703_v22 }
 0x15a   :  { %693 = vst [vmem:[#allocation5 + $0x10] sm:$0xff] %v659_v19  ;;  %v713_v26 = vrot.slane %v659_v19, 4 }
 0x15b   :  { %v708_v28 = vmax.f32 %v645_v17, %v707_v23  ;;  %696 = vst [vmem:[#allocation5 + $0x28] sm:$0xff] %v633_v24  ;;  %v731_v29 = vrot.slane %v633_v24, 4  ;;  %v705_v42 = vrot.slane %v704_v31, 1  ;;  %v3588_v17 = vor.u32 %v3996_v4, %v3585_v5 }
 0x15c   :  { %v714_v30 = vmax.f32 %v659_v19, %v713_v26  ;;  %v3884_v19 = vld [vmem:[#allocation2 + $0x130] sm:$0xf0] }
 0x15d   :  { %v732_v32 = vmax.f32 %v633_v24, %v731_v29  ;;  %v709_v35 = vrot.slane %v708_v28, 2  ;;  %v706_v57 = vmax.f32 %v704_v31, %v705_v42  ;;  %v3991_v24 = vld [vmem:[#allocation2 + $0x48c] sm:$0xf] }
 0x15e   :  { %v646_v34 = vpop.f32.mrf.mxu2  ;;  %v715_v39 = vrot.slane %v714_v30, 2 }
 0x15f   :  { %v733_v36 = vrot.slane %v732_v32, 2  ;;  %v647_v37 = vadd.f32 %v646_v34, %v504_v10  ;;  %v660_v38 = vpop.f32.mrf.mxu3  ;;  %v710_v50 = vmax.f32 %v708_v28, %v709_v35  ;;  %v4041_v10 = vld [vmem:[#allocation2 + $0x61c] sm:$0xf]  ;;  %v3132_v35 = vor.u32 %v3884_v19, %v3131_v18  ;;  %v3976_v19 = vld [vmem:[#allocation2 + $0x414] sm:$0xf] }
 0x160   :  { %v661_v40 = vadd.f32 %v660_v38, %v505_v11  ;;  %v672_v41 = vpop.f32.mrf.mxu1  ;;  %v716_v55 = vmax.f32 %v714_v30, %v715_v39  ;;  %v3768_v31 = vor.u32 %v4041_v10, %v3765_v15  ;;  %v3745_v38 = vld [vmem:[#allocation2 + $0x604] sm:$0xf0] }
 0x161   :  { %v734_v43 = vmax.f32 %v732_v32, %v733_v36  ;;  %697 = vst [vmem:[#allocation5 + $0x30] sm:$0xff] %v647_v37  ;;  %v737_v44 = vrot.slane %v647_v37, 4  ;;  %v673_v45 = vadd.f32 %v672_v41, %v506_v33  ;;  %v711_v0 = vrot.slane %v710_v50, 1 }
 0x162   :  { %698 = vst [vmem:[#allocation5 + $0x38] sm:$0xff] %v661_v40  ;;  %v743_v46 = vrot.slane %v661_v40, 4  ;;  %v717_v6 = vrot.slane %v716_v55, 1  ;;  %v3568_v36 = vor.u32 %v3991_v24, %v3565_v25 }
 0x163   :  { %v735_v51 = vrot.slane %v734_v43, 1  ;;  %v738_v52 = vmax.f32 %v647_v37, %v737_v44  ;;  %694 = vst [vmem:[#allocation5 + $0x18] sm:$0xff] %v673_v45  ;;  %v719_v53 = vrot.slane %v673_v45, 4  ;;  %v712_v20 = vmax.f32 %v710_v50, %v711_v0  ;;  %v4036_v37 = vld [vmem:[#allocation2 + $0x5f4] sm:$0xf] }
 0x164   :  { %v744_v56 = vmax.f32 %v661_v40, %v743_v46  ;;  %v718_v26 = vmax.f32 %v716_v55, %v717_v6  ;;  %v3879_v44 = vld [vmem:[#allocation2 + $0x108] sm:$0xf0]  ;;  %v3545_v46 = vld [vmem:[#allocation2 + $0x474] sm:$0xf0]  ;;  %v3748_v48 = vor.u32 %v4036_v37, %v3745_v38  ;;  %v3874_v55 = vld [vmem:[#allocation2 + $0xe0] sm:$0xf0] }
 0x165   :  { %v736_v58 = vmax.f32 %v734_v43, %v735_v51  ;;  %v739_v59 = vrot.slane %v738_v52, 2  ;;  %v720_v60 = vmax.f32 %v673_v45, %v719_v53  ;;  %v3111_v43 = vld [vmem:[#allocation2 + $0xf8] sm:$0xf]  ;;  %v3986_v45 = vld [vmem:[#allocation2 + $0x464] sm:$0xf]  ;;  %v3092_v10 = vor.u32 %v3874_v55, %v3091_v54 }
 0x166   :  { %v745_v61 = vrot.slane %v744_v56, 2  ;;  %v686_v62 = vpop.f32.mrf.mxu2  ;;  %v3725_v53 = vld [vmem:[#allocation2 + $0x5dc] sm:$0xf0]  ;;  %v3924_v0 = vld [vmem:[#allocation2 + $0x270] sm:$0xf0] }
 0x167   :  { %v4532_v1 = vsel %vm761_vm1, %v706_v57, %v736_v58  ;;  %v740_v2 = vmax.f32 %v738_v52, %v739_v59  ;;  %v687_v3 = vadd.f32 %v686_v62, %v507_v47  ;;  %v721_v12 = vrot.slane %v720_v60, 2  ;;  %v3525_v62 = vld [vmem:[#allocation2 + $0x44c] sm:$0xf0]  ;;  %v3051_v37 = vld [vmem:[#allocation2 + $0x80] sm:$0xf] }
 0x168   :  { %v746_v7 = vmax.f32 %v744_v56, %v745_v61  ;;  %v674_v8 = vpop.f32.mrf.mxu1  ;;  %v4538_v9 = vpack.c.bf16 %v4532_v1, %v4532_v1  ;;  %v3112_v52 = vor.u32 %v3879_v44, %v3111_v43  ;;  %v3981_v61 = vld [vmem:[#allocation2 + $0x43c] sm:$0xf]  ;;  %v3971_v43 = vld [vmem:[#allocation2 + $0x3ec] sm:$0xf]  ;;  %v3485_v44 = vld [vmem:[#allocation2 + $0x3fc] sm:$0xf0] }
 0x169   :  { %v741_v11 = vrot.slane %v740_v2, 1  ;;  %695 = vst [vmem:[#allocation5 + $0x20] sm:$0xff] %v687_v3  ;;  %v725_v13 = vrot.slane %v687_v3, 4  ;;  %v675_v14 = vadd.f32 %v674_v8, %v506_v33  ;;  %v722_v29 = vmax.f32 %v720_v60, %v721_v12  ;;  %v3705_v8 = vld [vmem:[#allocation2 + $0x5b4] sm:$0xf0] }
 0x16a   :  { %v747_v16 = vrot.slane %v746_v7, 1  ;;  %2060 = vmatmul.bf16.vlgmr.msra.gmra.mxu3 %v4538_v9  ;;  %v3548_v60 = vor.u32 %v3986_v45, %v3545_v46  ;;  %v3071_v12 = vld [vmem:[#allocation2 + $0xa8] sm:$0xf]  ;;  %v3251_v45 = vld [vmem:[#allocation2 + $0x210] sm:$0xf] }
 0x16b   :  { %v742_v21 = vmax.f32 %v740_v2, %v741_v11  ;;  %v726_v22 = vmax.f32 %v687_v3, %v725_v13  ;;  %699 = vst [vmem:[#allocation5 + $0x40] sm:$0xff] %v675_v14  ;;  %v749_v23 = vrot.slane %v675_v14, 4  ;;  %2156 = vmatpush.bf16.msra.mxu3 %v3608_v63  ;;  %v723_v49 = vrot.slane %v722_v29, 1  ;;  %v3291_v63 = vld [vmem:[#allocation2 + $0x260] sm:$0xf] }
 0x16c   :  { %v748_v27 = vmax.f32 %v746_v7, %v747_v16  ;;  %v2450_v2 = vmul.f32 %v4532_v1, %v4532_v1  ;;  %v4026_v7 = vld [vmem:[#allocation2 + $0x5a4] sm:$0xf]  ;;  %v3528_v11 = vor.u32 %v3981_v61, %v3525_v62  ;;  %v3869_v13 = vld [vmem:[#allocation2 + $0xb8] sm:$0xf0]  ;;  %v3292_v18 = vor.u32 %v3924_v0, %v3291_v63  ;;  %v4016_v55 = vld [vmem:[#allocation2 + $0x554] sm:$0xf] }
 0x16d   :  { %v4542_v28 = vsel %vm761_vm1, %v712_v20, %v742_v21  ;;  %v750_v30 = vmax.f32 %v675_v14, %v749_v23  ;;  %v727_v39 = vrot.slane %v726_v22, 2  ;;  %v724_v3 = vmax.f32 %v722_v29, %v723_v49  ;;  %v3505_v20 = vld [vmem:[#allocation2 + $0x424] sm:$0xf0]  ;;  %v3919_v23 = vld [vmem:[#allocation2 + $0x248] sm:$0xf0] }
 0x16e   :  { %v4545_v32 = vsel %vm761_vm1, %v718_v26, %v748_v27  ;;  %v688_v33 = vpop.f32.mrf.mxu2  ;;  %v4549_v34 = vpack.c.bf16 %v4542_v28, %v4542_v28  ;;  %v2451_v56 = vmul.f32 %v4542_v28, %v4542_v28  ;;  %v2455_v26 = vsel %vm2395_vm2, %v2450_v2, 0.0  ;;  %v3914_v46 = vld [vmem:[#allocation2 + $0x220] sm:$0xf0]  ;;  %v3859_v61 = vld [vmem:[#allocation2 + $0x68] sm:$0xf0] }
 0x16f   :  { %v751_v40 = vrot.slane %v750_v30, 2  ;;  %v689_v41 = vadd.f32 %v688_v33, %v507_v47  ;;  %2157 = vmatpush.bf16.msra.mxu3 %v3588_v17  ;;  %v4555_v42 = vpack.c.bf16 %v4545_v32, %v4545_v32  ;;  %v4031_v47 = vld [vmem:[#allocation2 + $0x5cc] sm:$0xf]  ;;  %v728_v57 = vmax.f32 %v726_v22, %v727_v39  ;;  %v3271_v22 = vld [vmem:[#allocation2 + $0x238] sm:$0xf] }
 0x170   :  { %2073 = vmatmul.bf16.vlgmr.msra.gmra.mxu0 %v4549_v34  ;;  %v3728_v6 = vor.u32 %v4031_v47, %v3725_v53  ;;  %v2456_v14 = vsel %vm2395_vm2, %v2451_v56, 0.0  ;;  %v2452_v24 = vmul.f32 %v4545_v32, %v4545_v32  ;;  %v3708_v29 = vor.u32 %v4026_v7, %v3705_v8  ;;  %v3665_v56 = vld [vmem:[#allocation2 + $0x564] sm:$0xf0]  ;;  %v3966_v62 = vld [vmem:[#allocation2 + $0x3c4] sm:$0xf] }
 0x171   :  { %v752_v50 = vmax.f32 %v750_v30, %v751_v40  ;;  %700 = vst [vmem:[#allocation5 + $0x48] sm:$0xff] %v689_v41  ;;  %v755_v51 = vrot.slane %v689_v41, 4  ;;  %2086 = vmatmul.bf16.vlgmr.msrb.gmra.mxu1 %v4555_v42  ;;  %2169 = vmatpush.bf16.msra.mxu0 %v3768_v31  ;;  %v729_v15 = vrot.slane %v728_v57, 1  ;;  %v2457_v30 = vadd.f32 %v2456_v14, %v2455_v26  ;;  %v3465_v63 = vld [vmem:[#allocation2 + $0x3d4] sm:$0xf0] }
 0x172   :  { %2182 = vmatpush.bf16.msrb.mxu1 %v3132_v35  ;;  %v3072_v31 = vor.u32 %v3869_v13, %v3071_v12  ;;  %v3508_v33 = vor.u32 %v3976_v19, %v3505_v20  ;;  %v4021_v35 = vld [vmem:[#allocation2 + $0x57c] sm:$0xf]  ;;  %v3272_v40 = vor.u32 %v3919_v23, %v3271_v22  ;;  %v2458_v49 = vsel %vm2395_vm2, %v2452_v24, 0.0  ;;  %v3231_v2 = vld [vmem:[#allocation2 + $0x1e8] sm:$0xf] }
 0x173   :  { %v753_v58 = vrot.slane %v752_v50, 1  ;;  %v756_v59 = vmax.f32 %v689_v41, %v755_v51  ;;  %2158 = vmatpush.bf16.msra.mxu3 %v3568_v36  ;;  %v3685_v36 = vld [vmem:[#allocation2 + $0x58c] sm:$0xf0]  ;;  %v730_v38 = vmax.f32 %v728_v57, %v729_v15  ;;  %v3864_v41 = vld [vmem:[#allocation2 + $0x90] sm:$0xf0]  ;;  %v2459_v47 = vadd.f32 %v2458_v49, %v2457_v30 }
 0x174   :  { %v3052_v53 = vor.u32 %v3864_v41, %v3051_v37  ;;  %v3031_v57 = vld [vmem:[#allocation2 + $0x58] sm:$0xf]  ;;  %v3964_v7 = vld [vmem:[#allocation2 + $0x3b0] sm:$0xf0]  ;;  %v3468_v12 = vor.u32 %v3966_v62, %v3465_v63  ;;  %v3011_v14 = vld [vmem:[#allocation2 + $0x30] sm:$0xf] }
 0x175   :  { %v754_v4 = vmax.f32 %v752_v50, %v753_v58  ;;  %v757_v5 = vrot.slane %v756_v59, 2  ;;  %2170 = vmatpush.bf16.msra.mxu0 %v3748_v48  ;;  %v3688_v48 = vor.u32 %v4021_v35, %v3685_v36  ;;  %v3488_v58 = vor.u32 %v3971_v43, %v3485_v44  ;;  %v3854_v15 = vld [vmem:[#allocation2 + $0x40] sm:$0xf0]  ;;  %v3904_v19 = vld [vmem:[#allocation2 + $0x1d0] sm:$0xf0] }
 0x176   :  { %2183 = vmatpush.bf16.msrb.mxu1 %v3112_v52  ;;  %v3032_v8 = vor.u32 %v3859_v61, %v3031_v57  ;;  %v3431_v22 = vld [vmem:[#allocation2 + $0x378] sm:$0xf]  ;;  %v3959_v23 = vld [vmem:[#allocation2 + $0x388] sm:$0xf0]  ;;  %v4006_v24 = vld [vmem:[#allocation2 + $0x504] sm:$0xf] }
 0x177   :  { %v4565_v16 = vsel %vm761_vm1, %v724_v3, %v754_v4  ;;  %v758_v17 = vmax.f32 %v756_v59, %v757_v5  ;;  %2159 = vmatpush.bf16.msra.mxu3 %v3548_v60  ;;  %v3252_v59 = vor.u32 %v3914_v46, %v3251_v45  ;;  %v3909_v3 = vld [vmem:[#allocation2 + $0x1f8] sm:$0xf0]  ;;  %v3668_v5 = vor.u32 %v4016_v55, %v3665_v56  ;;  %v3625_v26 = vld [vmem:[#allocation2 + $0x514] sm:$0xf0]  ;;  %v3771_v35 = vld [vmem:[#allocation2 + $0x620] sm:$0xf] }
 0x178   :  { %v4569_v21 = vpack.c.bf16 %v4565_v16, %v4565_v16  ;;  %v2453_v25 = vmul.f32 %v4565_v16, %v4565_v16  ;;  %v3232_v13 = vor.u32 %v3909_v3, %v3231_v2  ;;  %v3432_v36 = vor.u32 %v3959_v23, %v3431_v22  ;;  %v4044_v37 = vld [vmem:[#allocation2 + $0x630] sm:$0xf0]  ;;  %v3411_v41 = vld [vmem:[#allocation2 + $0x350] sm:$0xf]  ;;  %v3954_v43 = vld [vmem:[#allocation2 + $0x360] sm:$0xf0] }
 0x179   :  { %v759_v27 = vrot.slane %v758_v17, 1  ;;  %2171 = vmatpush.bf16.msra.mxu0 %v3728_v6  ;;  %v3451_v6 = vld [vmem:[#allocation2 + $0x3a0] sm:$0xf]  ;;  %v3772_v46 = vor.u32 %v4044_v37, %v3771_v35  ;;  %v3171_v55 = vld [vmem:[#allocation2 + $0x170] sm:$0xf] }
 0x17a   :  { %2184 = vmatpush.bf16.msrb.mxu1 %v3092_v10  ;;  %2099 = vmatmul.bf16.vlgmr.msrb.gmra.mxu2 %v4569_v21  ;;  %v2460_v50 = vsel %vm2395_vm2, %v2453_v25, 0.0  ;;  %v4011_v10 = vld [vmem:[#allocation2 + $0x52c] sm:$0xf]  ;;  %v3012_v25 = vor.u32 %v3854_v15, %v3011_v14  ;;  %v3894_v56 = vld [vmem:[#allocation2 + $0x180] sm:$0xf0] }
 0x17b   :  { %v760_v39 = vmax.f32 %v758_v17, %v759_v27  ;;  %2160 = vmatpush.bf16.msra.mxu3 %v3528_v11  ;;  %2195 = vmatpush.bf16.msrb.mxu2 %v3292_v18  ;;  %v2461_v60 = vadd.f32 %v2460_v50, %v2459_v47  ;;  %v3645_v11 = vld [vmem:[#allocation2 + $0x53c] sm:$0xf0]  ;;  %v3452_v17 = vor.u32 %v3964_v7, %v3451_v6  ;;  %v2991_v27 = vld [vmem:[#allocation2 + $0x8] sm:$0xf]  ;;  %v3591_v50 = vld [vmem:[#allocation2 + $0x4b8] sm:$0xf] }
 0x17c   :  { %v3211_v18 = vld [vmem:[#allocation2 + $0x1c0] sm:$0xf]  ;;  %v3648_v20 = vor.u32 %v4011_v10, %v3645_v11  ;;  %v3751_v47 = vld [vmem:[#allocation2 + $0x5f8] sm:$0xf]  ;;  %v3391_v57 = vld [vmem:[#allocation2 + $0x328] sm:$0xf]  ;;  %v3172_v62 = vor.u32 %v3894_v56, %v3171_v55 }
 0x17d   :  { %v4580_v51 = vsel %vm761_vm1, %v730_v38, %v760_v39  ;;  %2172 = vmatpush.bf16.msra.mxu0 %v3708_v29  ;;  %v3849_v29 = vld [vmem:[#allocation2 + $0x18] sm:$0xf0]  ;;  %v3212_v30 = vor.u32 %v3904_v19, %v3211_v18  ;;  %v3191_v38 = vld [vmem:[#allocation2 + $0x198] sm:$0xf]  ;;  %v3899_v39 = vld [vmem:[#allocation2 + $0x1a8] sm:$0xf0] }
 0x17e   :  { %2185 = vmatpush.bf16.msrb.mxu1 %v3072_v31  ;;  %v4584_v52 = vpack.c.bf16 %v4580_v51, %v4580_v51  ;;  %v2454_v54 = vmul.f32 %v4580_v51, %v4580_v51  ;;  %v3611_v31 = vld [vmem:[#allocation2 + $0x4e0] sm:$0xf]  ;;  %v2992_v44 = vor.u32 %v3849_v29, %v2991_v27  ;;  %v3192_v49 = vor.u32 %v3899_v39, %v3191_v38  ;;  %v3994_v63 = vld [vmem:[#allocation2 + $0x4a0] sm:$0xf0]  ;;  %v3944_v7 = vld [vmem:[#allocation2 + $0x310] sm:$0xf0] }
 0x17f   :  { %2161 = vmatpush.bf16.msra.mxu3 %v3508_v33  ;;  %2196 = vmatpush.bf16.msrb.mxu2 %v3272_v40  ;;  %v4004_v33 = vld [vmem:[#allocation2 + $0x4f0] sm:$0xf0]  ;;  %v3628_v40 = vor.u32 %v4006_v24, %v3625_v26  ;;  %v4034_v2 = vld [vmem:[#allocation2 + $0x5e0] sm:$0xf0]  ;;  %v3371_v6 = vld [vmem:[#allocation2 + $0x300] sm:$0xf] }
 0x180   :  { %2112 = vmatmul.bf16.vlgmr.msrb.gmra.mxu3 %v4584_v52  ;;  %2125 = vmatmul.bf16.vlgmr.msrb.gmra.mxu0 %v4538_v9  ;;  %v2462_v0 = vsel %vm2395_vm2, %v2454_v54, 0.0  ;;  %v3612_v45 = vor.u32 %v4004_v33, %v3611_v31  ;;  %v4039_v54 = vld [vmem:[#allocation2 + $0x608] sm:$0xf0]  ;;  %v3133_v10 = vld [vmem:[#allocation2 + $0x134] sm:$0xf0] }
 0x181   :  { %2138 = vmatmul.bf16.vlgmr.msra.gmra.mxu1 %v4549_v34  ;;  %2173 = vmatpush.bf16.msra.mxu0 %v3688_v48  ;;  %v2463_v4 = vadd.f32 %v2462_v0, %v2461_v60  ;;  %v3999_v48 = vld [vmem:[#allocation2 + $0x4c8] sm:$0xf0]  ;;  %v3571_v60 = vld [vmem:[#allocation2 + $0x490] sm:$0xf]  ;;  %v3752_v61 = vor.u32 %v4039_v54, %v3751_v47  ;;  %v3551_v14 = vld [vmem:[#allocation2 + $0x468] sm:$0xf] }
 0x182   :  { %2186 = vmatpush.bf16.msrb.mxu1 %v3052_v53  ;;  %v3412_v53 = vor.u32 %v3954_v43, %v3411_v41  ;;  %v3731_v0 = vld [vmem:[#allocation2 + $0x5d0] sm:$0xf]  ;;  %v3572_v11 = vor.u32 %v3994_v63, %v3571_v60  ;;  %v3989_v15 = vld [vmem:[#allocation2 + $0x478] sm:$0xf0]  ;;  %v3711_v19 = vld [vmem:[#allocation2 + $0x5a8] sm:$0xf] }
 0x183   :  { %2162 = vmatpush.bf16.msra.mxu3 %v3488_v58  ;;  %2197 = vmatpush.bf16.msrb.mxu2 %v3252_v59  ;;  %v3949_v58 = vld [vmem:[#allocation2 + $0x338] sm:$0xf0]  ;;  %v3592_v59 = vor.u32 %v3999_v48, %v3591_v50  ;;  %v3351_v22 = vld [vmem:[#allocation2 + $0x2d8] sm:$0xf]  ;;  %v3939_v23 = vld [vmem:[#allocation2 + $0x2e8] sm:$0xf0]  ;;  %v3552_v26 = vor.u32 %v3989_v15, %v3551_v14 }
 0x184   :  { %2464 = vadd.xlane.f32.xlu0 %v2463_v4  ;;  %v3392_v3 = vor.u32 %v3949_v58, %v3391_v57  ;;  %v3151_v4 = vld [vmem:[#allocation2 + $0x148] sm:$0xf]  ;;  %v3877_v24 = vld [vmem:[#allocation2 + $0xfc] sm:$0xf]  ;;  %v3531_v29 = vld [vmem:[#allocation2 + $0x440] sm:$0xf]  ;;  %v3352_v31 = vor.u32 %v3939_v23, %v3351_v22 }
 0x185   :  { %2174 = vmatpush.bf16.msra.mxu0 %v3668_v5  ;;  %v3889_v5 = vld [vmem:[#allocation2 + $0x158] sm:$0xf0]  ;;  %v3691_v35 = vld [vmem:[#allocation2 + $0x580] sm:$0xf]  ;;  %v3331_v37 = vld [vmem:[#allocation2 + $0x2b0] sm:$0xf] }
 0x186   :  { %2187 = vmatpush.bf16.msrb.mxu1 %v3032_v8  ;;  %v3882_v8 = vld [vmem:[#allocation2 + $0x124] sm:$0xf]  ;;  %v3872_v39 = vld [vmem:[#allocation2 + $0xd4] sm:$0xf]  ;;  %v3671_v50 = vld [vmem:[#allocation2 + $0x558] sm:$0xf] }
 0x187   :  { %2163 = vmatpush.bf16.msra.mxu3 %v3468_v12  ;;  %2198 = vmatpush.bf16.msrb.mxu2 %v3232_v13  ;;  %v3732_v12 = vor.u32 %v4034_v2, %v3731_v0  ;;  %v3152_v13 = vor.u32 %v3889_v5, %v3151_v4  ;;  %v3136_v18 = vor.u32 %v3882_v8, %v3133_v10  ;;  %v3934_v38 = vld [vmem:[#allocation2 + $0x2c0] sm:$0xf0]  ;;  %v4019_v48 = vld [vmem:[#allocation2 + $0x568] sm:$0xf0]  ;;  %v3311_v47 = vld [vmem:[#allocation2 + $0x288] sm:$0xf] }
 0x188   :  { %v3867_v54 = vld [vmem:[#allocation2 + $0xac] sm:$0xf]  ;;  %v3073_v55 = vld [vmem:[#allocation2 + $0xbc] sm:$0xf0]  ;;  %v3922_v57 = vld [vmem:[#allocation2 + $0x264] sm:$0xf] }
 0x189   :  { %2175 = vmatpush.bf16.msra.mxu0 %v3648_v20  ;;  %v4029_v20 = vld [vmem:[#allocation2 + $0x5b8] sm:$0xf0]  ;;  %v3293_v58 = vld [vmem:[#allocation2 + $0x274] sm:$0xf0]  ;;  %v3491_v60 = vld [vmem:[#allocation2 + $0x3f0] sm:$0xf]  ;;  %v3076_v63 = vor.u32 %v3867_v54, %v3073_v55 }
 0x18a   :  { %2188 = vmatpush.bf16.msrb.mxu1 %v3012_v25  ;;  %2151 = vmatmul.bf16.vlgmr.msra.gmra.mxu2 %v4555_v42  ;;  %v3113_v25 = vld [vmem:[#allocation2 + $0x10c] sm:$0xf0]  ;;  %v3712_v27 = vor.u32 %v4029_v20, %v3711_v19  ;;  %v4014_v2 = vld [vmem:[#allocation2 + $0x540] sm:$0xf0]  ;;  %v3053_v5 = vld [vmem:[#allocation2 + $0x94] sm:$0xf0] }
 0x18b   :  { %2208 = vmatpush.bf16.msrb.mxu3 %v3452_v17  ;;  %2199 = vmatpush.bf16.msrb.mxu2 %v3212_v30  ;;  %v3372_v17 = vor.u32 %v3944_v7, %v3371_v6  ;;  %v3984_v30 = vld [vmem:[#allocation2 + $0x450] sm:$0xf0]  ;;  %v3116_v33 = vor.u32 %v3877_v24, %v3113_v25  ;;  %v3651_v0 = vld [vmem:[#allocation2 + $0x530] sm:$0xf]  ;;  %v3862_v4 = vld [vmem:[#allocation2 + $0x84] sm:$0xf] }
 0x18c   :  { %v3532_v41 = vor.u32 %v3984_v30, %v3531_v29  ;;  %v3917_v7 = vld [vmem:[#allocation2 + $0x23c] sm:$0xf]  ;;  %v3273_v8 = vld [vmem:[#allocation2 + $0x24c] sm:$0xf0]  ;;  %v3471_v10 = vld [vmem:[#allocation2 + $0x3c8] sm:$0xf]  ;;  %v3056_v15 = vor.u32 %v3862_v4, %v3053_v5 }
 0x18d   :  { %2176 = vmatpush.bf16.msra.mxu0 %v3628_v40  ;;  %v3093_v40 = vld [vmem:[#allocation2 + $0xe4] sm:$0xf0]  ;;  %v4009_v14 = vld [vmem:[#allocation2 + $0x518] sm:$0xf0]  ;;  %v4002_v19 = vld [vmem:[#allocation2 + $0x4e4] sm:$0xf]  ;;  %v3276_v20 = vor.u32 %v3917_v7, %v3273_v8 }
 0x18e   :  { %2189 = vmatpush.bf16.msrb.mxu1 %v2992_v44  ;;  %v3511_v44 = vld [vmem:[#allocation2 + $0x418] sm:$0xf]  ;;  %v3857_v23 = vld [vmem:[#allocation2 + $0x5c] sm:$0xf]  ;;  %v3033_v24 = vld [vmem:[#allocation2 + $0x6c] sm:$0xf0] }
 0x18f   :  { %2209 = vmatpush.bf16.msrb.mxu3 %v3432_v36  ;;  %2200 = vmatpush.bf16.msrb.mxu2 %v3192_v49  ;;  %v4024_v36 = vld [vmem:[#allocation2 + $0x590] sm:$0xf0]  ;;  %v3096_v49 = vor.u32 %v3872_v39, %v3093_v40  ;;  %v3613_v22 = vld [vmem:[#allocation2 + $0x4f4] sm:$0xf0]  ;;  %v3593_v39 = vld [vmem:[#allocation2 + $0x4cc] sm:$0xf0] }
 0x190   :  { %2177 = vmatmul.bf16.vlgmr.msra.gmra.mxu0 %v4584_v52  ;;  %2164 = vmatmul.bf16.vlgmr.msra.gmra.mxu3 %v4569_v21  ;;  %v3692_v43 = vor.u32 %v4024_v36, %v3691_v35  ;;  %v3957_v35 = vld [vmem:[#allocation2 + $0x37c] sm:$0xf]  ;;  %v3433_v36 = vld [vmem:[#allocation2 + $0x38c] sm:$0xf0]  ;;  %v3852_v40 = vld [vmem:[#allocation2 + $0x34] sm:$0xf] }
 0x191   :  { %2221 = vmatpush.bf16.msrb.mxu0 %v3612_v45  ;;  %2190 = vmatmul.bf16.vlgmr.msrb.gmra.mxu1 %v4538_v9  ;;  %v3979_v45 = vld [vmem:[#allocation2 + $0x428] sm:$0xf0]  ;;  %v3897_v7 = vld [vmem:[#allocation2 + $0x19c] sm:$0xf]  ;;  %v3193_v8 = vld [vmem:[#allocation2 + $0x1ac] sm:$0xf0] }
 0x192   :  { %2234 = vmatpush.bf16.msra.mxu1 %v3772_v46  ;;  %v3332_v46 = vor.u32 %v3934_v38, %v3331_v37  ;;  %v3512_v56 = vor.u32 %v3979_v45, %v3511_v44  ;;  %v3997_v37 = vld [vmem:[#allocation2 + $0x4bc] sm:$0xf]  ;;  %v3233_v44 = vld [vmem:[#allocation2 + $0x1fc] sm:$0xf0]  ;;  %v3436_v45 = vor.u32 %v3957_v35, %v3433_v36  ;;  %v3847_v55 = vld [vmem:[#allocation2 + $0xc] sm:$0xf] }
 0x193   :  { %2210 = vmatpush.bf16.msrb.mxu3 %v3412_v53  ;;  %2201 = vmatpush.bf16.msrb.mxu2 %v3172_v62  ;;  %v3929_v53 = vld [vmem:[#allocation2 + $0x298] sm:$0xf0]  ;;  %v3987_v5 = vld [vmem:[#allocation2 + $0x46c] sm:$0xf]  ;;  %v3513_v36 = vld [vmem:[#allocation2 + $0x42c] sm:$0xf0] }
 0x194   :  { %v3312_v62 = vor.u32 %v3929_v53, %v3311_v47  ;;  %v3992_v47 = vld [vmem:[#allocation2 + $0x494] sm:$0xf]  ;;  %v3573_v53 = vld [vmem:[#allocation2 + $0x4a4] sm:$0xf0]  ;;  %v3977_v35 = vld [vmem:[#allocation2 + $0x41c] sm:$0xf] }
 0x195   :  { %2222 = vmatpush.bf16.msrb.mxu0 %v3592_v59  ;;  %v3672_v59 = vor.u32 %v4019_v48, %v3671_v50  ;;  %v3413_v48 = vld [vmem:[#allocation2 + $0x364] sm:$0xf0]  ;;  %2676 = dma.vmem_to_hbm [thread:$0]  %s2669_s25, 1280, %s2671_s28, [#allocation4], %s4177_s22, %s4177_s22, %s4178_s23  }
 0x196   :  { %2235 = vmatpush.bf16.msra.mxu1 %v3752_v61  ;;  %v3974_v61 = vld [vmem:[#allocation2 + $0x400] sm:$0xf0] }
 0x197   :  { %2211 = vmatpush.bf16.msrb.mxu3 %v3392_v3  ;;  %2202 = vmatpush.bf16.msrb.mxu2 %v3152_v13  ;;  %v3296_v3 = vor.u32 %v3922_v57, %v3293_v58  ;;  %v3492_v6 = vor.u32 %v3974_v61, %v3491_v60  ;;  %v3631_v13 = vld [vmem:[#allocation2 + $0x508] sm:$0xf]  ;;  %v3902_v57 = vld [vmem:[#allocation2 + $0x1c4] sm:$0xf]  ;;  %v3213_v58 = vld [vmem:[#allocation2 + $0x1d4] sm:$0xf0] }
 0x198   :  { %v3632_v29 = vor.u32 %v4009_v14, %v3631_v13  ;;  %v3773_v60 = vld [vmem:[#allocation2 + $0x634] sm:$0xf0]  ;;  %v3942_v14 = vld [vmem:[#allocation2 + $0x304] sm:$0xf] }
 0x199   :  { %2223 = vmatpush.bf16.msrb.mxu0 %v3572_v11  ;;  %v3652_v11 = vor.u32 %v4014_v2, %v3651_v0  ;;  %v3947_v0 = vld [vmem:[#allocation2 + $0x32c] sm:$0xf]  ;;  %v3393_v2 = vld [vmem:[#allocation2 + $0x33c] sm:$0xf0] }
 0x19a   :  { %2236 = vmatpush.bf16.msra.mxu1 %v3732_v12  ;;  %2203 = vmatmul.bf16.vlgmr.msrb.gmra.mxu2 %v4549_v34  ;;  %v3969_v12 = vld [vmem:[#allocation2 + $0x3d8] sm:$0xf0] }
 0x19b   :  { %2212 = vmatpush.bf16.msrb.mxu3 %v3372_v17  ;;  %2247 = vmatpush.bf16.msra.mxu2 %v3136_v18  ;;  %v3962_v17 = vld [vmem:[#allocation2 + $0x3a4] sm:$0xf]  ;;  %v3453_v18 = vld [vmem:[#allocation2 + $0x3b4] sm:$0xf0]  ;;  %v3472_v25 = vor.u32 %v3969_v12, %v3471_v10  ;;  %v4037_v10 = vld [vmem:[#allocation2 + $0x5fc] sm:$0xf]  ;;  %v3396_v12 = vor.u32 %v3947_v0, %v3393_v2 }
 0x19c   :  { %v3456_v30 = vor.u32 %v3962_v17, %v3453_v18  ;;  %v3196_v17 = vor.u32 %v3897_v7, %v3193_v8  ;;  %v3473_v0 = vld [vmem:[#allocation2 + $0x3dc] sm:$0xf0]  ;;  %v3965_v7 = vld [vmem:[#allocation2 + $0x3b8] sm:$0xf0] }
 0x19d   :  { %2224 = vmatpush.bf16.msrb.mxu0 %v3552_v26  ;;  %v3912_v26 = vld [vmem:[#allocation2 + $0x214] sm:$0xf]  ;;  %v4017_v8 = vld [vmem:[#allocation2 + $0x55c] sm:$0xf] }
 0x19e   :  { %2237 = vmatpush.bf16.msra.mxu1 %v3712_v27  ;;  %v3253_v27 = vld [vmem:[#allocation2 + $0x224] sm:$0xf0] }
 0x19f   :  { %2213 = vmatpush.bf16.msrb.mxu3 %v3352_v31  ;;  %2248 = vmatpush.bf16.msra.mxu2 %v3116_v33  ;;  %v3616_v31 = vor.u32 %v4002_v19, %v3613_v22  ;;  %v3036_v33 = vor.u32 %v3857_v23, %v3033_v24  ;;  %v3256_v38 = vor.u32 %v3912_v26, %v3253_v27  ;;  %v3982_v19 = vld [vmem:[#allocation2 + $0x444] sm:$0xf]  ;;  %v3892_v22 = vld [vmem:[#allocation2 + $0x174] sm:$0xf]  ;;  %v3173_v23 = vld [vmem:[#allocation2 + $0x184] sm:$0xf0] }
 0x1a0   :  { %v4032_v24 = vld [vmem:[#allocation2 + $0x5d4] sm:$0xf] }
 0x1a1   :  { %2225 = vmatpush.bf16.msrb.mxu0 %v3532_v41  ;;  %v3013_v41 = vld [vmem:[#allocation2 + $0x44] sm:$0xf0] }
 0x1a2   :  { %2238 = vmatpush.bf16.msra.mxu1 %v3692_v43  ;;  %v3907_v43 = vld [vmem:[#allocation2 + $0x1ec] sm:$0xf]  ;;  %v3016_v50 = vor.u32 %v3852_v40, %v3013_v41  ;;  %v3713_v40 = vld [vmem:[#allocation2 + $0x5bc] sm:$0xf0] }
 0x1a3   :  { %2214 = vmatpush.bf16.msrb.mxu3 %v3332_v46  ;;  %2249 = vmatpush.bf16.msra.mxu2 %v3096_v49  ;;  %v3952_v46 = vld [vmem:[#allocation2 + $0x354] sm:$0xf]  ;;  %v3596_v49 = vor.u32 %v3997_v37, %v3593_v39  ;;  %v3236_v54 = vor.u32 %v3907_v43, %v3233_v44  ;;  %v3887_v37 = vld [vmem:[#allocation2 + $0x14c] sm:$0xf]  ;;  %v3139_v43 = vld [vmem:[#allocation2 + $0x128] sm:$0xf] }
 0x1a4   :  { %v3416_v61 = vor.u32 %v3952_v46, %v3413_v48  ;;  %v4027_v39 = vld [vmem:[#allocation2 + $0x5ac] sm:$0xf]  ;;  %v3885_v44 = vld [vmem:[#allocation2 + $0x138] sm:$0xf0]  ;;  %v3932_v46 = vld [vmem:[#allocation2 + $0x2b4] sm:$0xf] }
 0x1a5   :  { %2226 = vmatpush.bf16.msrb.mxu0 %v3512_v56  ;;  %v2993_v56 = vld [vmem:[#allocation2 + $0x1c] sm:$0xf0]  ;;  %v3716_v48 = vor.u32 %v4027_v39, %v3713_v40  ;;  %v4007_v40 = vld [vmem:[#allocation2 + $0x50c] sm:$0xf] }
 0x1a6   :  { %2239 = vmatpush.bf16.msra.mxu1 %v3672_v59  ;;  %v4042_v59 = vld [vmem:[#allocation2 + $0x624] sm:$0xf] }
 0x1a7   :  { %2215 = vmatpush.bf16.msrb.mxu3 %v3312_v62  ;;  %2250 = vmatpush.bf16.msra.mxu2 %v3076_v63  ;;  %v3576_v62 = vor.u32 %v3992_v47, %v3573_v53  ;;  %v2996_v63 = vor.u32 %v3847_v55, %v2993_v56  ;;  %v3776_v4 = vor.u32 %v4042_v59, %v3773_v60  ;;  %v3972_v47 = vld [vmem:[#allocation2 + $0x3f4] sm:$0xf]  ;;  %v3493_v53 = vld [vmem:[#allocation2 + $0x404] sm:$0xf0]  ;;  %v4022_v55 = vld [vmem:[#allocation2 + $0x584] sm:$0xf] }
 0x1a8   :  { %v3693_v56 = vld [vmem:[#allocation2 + $0x594] sm:$0xf0]  ;;  %v3880_v59 = vld [vmem:[#allocation2 + $0x110] sm:$0xf0]  ;;  %v3927_v60 = vld [vmem:[#allocation2 + $0x28c] sm:$0xf] }
 0x1a9   :  { %2227 = vmatpush.bf16.msrb.mxu0 %v3492_v6  ;;  %v3553_v6 = vld [vmem:[#allocation2 + $0x47c] sm:$0xf0]  ;;  %v3696_v2 = vor.u32 %v4022_v55, %v3693_v56  ;;  %v3399_v56 = vld [vmem:[#allocation2 + $0x330] sm:$0xf] }
 0x1aa   :  { %2240 = vmatpush.bf16.msra.mxu1 %v3652_v11  ;;  %2216 = vmatmul.bf16.vlgmr.msrb.gmra.mxu3 %v4555_v42  ;;  %v3753_v11 = vld [vmem:[#allocation2 + $0x60c] sm:$0xf0]  ;;  %v3556_v13 = vor.u32 %v3987_v5, %v3553_v6  ;;  %v3459_v5 = vld [vmem:[#allocation2 + $0x3a8] sm:$0xf] }
 0x1ab   :  { %2260 = vmatpush.bf16.msra.mxu3 %v3296_v3  ;;  %2251 = vmatpush.bf16.msra.mxu2 %v3056_v15  ;;  %v3216_v3 = vor.u32 %v3902_v57, %v3213_v58  ;;  %v3373_v15 = vld [vmem:[#allocation2 + $0x314] sm:$0xf0]  ;;  %v3756_v18 = vor.u32 %v4037_v10, %v3753_v11  ;;  %v3119_v58 = vld [vmem:[#allocation2 + $0x100] sm:$0xf]  ;;  %v3673_v10 = vld [vmem:[#allocation2 + $0x56c] sm:$0xf0] }
 0x1ac   :  { %v3376_v26 = vor.u32 %v3942_v14, %v3373_v15  ;;  %v3120_v6 = vor.u32 %v3880_v59, %v3119_v58  ;;  %v3039_v58 = vld [vmem:[#allocation2 + $0x60] sm:$0xf]  ;;  %v3860_v59 = vld [vmem:[#allocation2 + $0x70] sm:$0xf0] }
 0x1ad   :  { %2228 = vmatpush.bf16.msrb.mxu0 %v3472_v25  ;;  %v3733_v25 = vld [vmem:[#allocation2 + $0x5e4] sm:$0xf0] }
 0x1ae   :  { %2241 = vmatpush.bf16.msra.mxu1 %v3632_v29  ;;  %v3937_v29 = vld [vmem:[#allocation2 + $0x2dc] sm:$0xf] }
 0x1af   :  { %2261 = vmatpush.bf16.msra.mxu3 %v3276_v20  ;;  %2252 = vmatpush.bf16.msra.mxu2 %v3036_v33  ;;  %v3533_v20 = vld [vmem:[#allocation2 + $0x454] sm:$0xf0]  ;;  %v3736_v33 = vor.u32 %v4032_v24, %v3733_v25  ;;  %v3960_v24 = vld [vmem:[#allocation2 + $0x390] sm:$0xf0] }
 0x1b0   :  { %2229 = vmatmul.bf16.vlgmr.msrb.gmra.mxu0 %v4569_v21  ;;  %v3536_v27 = vor.u32 %v3982_v19, %v3533_v20  ;;  %v3279_v19 = vld [vmem:[#allocation2 + $0x240] sm:$0xf]  ;;  %v3920_v20 = vld [vmem:[#allocation2 + $0x250] sm:$0xf0] }
 0x1b1   :  { %2273 = vmatpush.bf16.msra.mxu0 %v3456_v30  ;;  %2242 = vmatmul.bf16.vlgmr.msra.gmra.mxu1 %v4584_v52  ;;  %v3353_v30 = vld [vmem:[#allocation2 + $0x2ec] sm:$0xf0]  ;;  %v4012_v25 = vld [vmem:[#allocation2 + $0x534] sm:$0xf] }
 0x1b2   :  { %2286 = vmatpush.bf16.msrb.mxu1 %v3616_v31  ;;  %v3176_v31 = vor.u32 %v3892_v22, %v3173_v23  ;;  %v3356_v41 = vor.u32 %v3937_v29, %v3353_v30  ;;  %v3439_v22 = vld [vmem:[#allocation2 + $0x380] sm:$0xf]  ;;  %v3870_v29 = vld [vmem:[#allocation2 + $0xc0] sm:$0xf0]  ;;  %v3280_v30 = vor.u32 %v3920_v20, %v3279_v19  ;;  %v3940_v20 = vld [vmem:[#allocation2 + $0x2f0] sm:$0xf0] }
 0x1b3   :  { %2262 = vmatpush.bf16.msra.mxu3 %v3256_v38  ;;  %2253 = vmatpush.bf16.msra.mxu2 %v3016_v50  ;;  %v3153_v38 = vld [vmem:[#allocation2 + $0x15c] sm:$0xf0] }
 0x1b4   :  { %v3156_v50 = vor.u32 %v3887_v37, %v3153_v38  ;;  %v3419_v37 = vld [vmem:[#allocation2 + $0x358] sm:$0xf]  ;;  %v3955_v38 = vld [vmem:[#allocation2 + $0x368] sm:$0xf0]  ;;  %v3359_v19 = vld [vmem:[#allocation2 + $0x2e0] sm:$0xf] }
 0x1b5   :  { %2274 = vmatpush.bf16.msra.mxu0 %v3436_v45  ;;  %v3516_v45 = vor.u32 %v3977_v35, %v3513_v36  ;;  %v3915_v36 = vld [vmem:[#allocation2 + $0x228] sm:$0xf0] }
 0x1b6   :  { %2287 = vmatpush.bf16.msrb.mxu1 %v3596_v49  ;;  %v3333_v49 = vld [vmem:[#allocation2 + $0x2c4] sm:$0xf0] }
 0x1b7   :  { %2263 = vmatpush.bf16.msra.mxu3 %v3236_v54  ;;  %2254 = vmatpush.bf16.msra.mxu2 %v2996_v63  ;;  %v3140_v54 = vor.u32 %v3885_v44, %v3139_v43  ;;  %v3336_v57 = vor.u32 %v3932_v46, %v3333_v49  ;;  %v3967_v63 = vld [vmem:[#allocation2 + $0x3cc] sm:$0xf]  ;;  %v3059_v43 = vld [vmem:[#allocation2 + $0x88] sm:$0xf]  ;;  %v3865_v44 = vld [vmem:[#allocation2 + $0x98] sm:$0xf0] }
 0x1b8   :  { %v3476_v14 = vor.u32 %v3967_v63, %v3473_v0  ;;  %v4005_v46 = vld [vmem:[#allocation2 + $0x4f8] sm:$0xf0]  ;;  %v3219_v0 = vld [vmem:[#allocation2 + $0x1c8] sm:$0xf] }
 0x1b9   :  { %2275 = vmatpush.bf16.msra.mxu0 %v3416_v61  ;;  %v3496_v61 = vor.u32 %v3972_v47, %v3493_v53  ;;  %v3239_v47 = vld [vmem:[#allocation2 + $0x1f0] sm:$0xf]  ;;  %v3910_v53 = vld [vmem:[#allocation2 + $0x200] sm:$0xf0] }
 0x1ba   :  { %2288 = vmatpush.bf16.msrb.mxu1 %v3576_v62  ;;  %2255 = vmatmul.bf16.vlgmr.msra.gmra.mxu2 %v4538_v9  ;;  %v3313_v62 = vld [vmem:[#allocation2 + $0x29c] sm:$0xf0] }
 0x1bb   :  { %2264 = vmatpush.bf16.msra.mxu3 %v3216_v3  ;;  %2299 = vmatpush.bf16.msrb.mxu2 %v3776_v4  ;;  %v3299_v3 = vld [vmem:[#allocation2 + $0x268] sm:$0xf]  ;;  %v3925_v4 = vld [vmem:[#allocation2 + $0x278] sm:$0xf0]  ;;  %v3316_v11 = vor.u32 %v3927_v60, %v3313_v62  ;;  %v3599_v60 = vld [vmem:[#allocation2 + $0x4c0] sm:$0xf]  ;;  %v3240_v62 = vor.u32 %v3910_v53, %v3239_v47 }
 0x1bc   :  { %v3300_v15 = vor.u32 %v3925_v4, %v3299_v3  ;;  %v3040_v3 = vor.u32 %v3860_v59, %v3039_v58  ;;  %v3319_v47 = vld [vmem:[#allocation2 + $0x290] sm:$0xf]  ;;  %v3930_v53 = vld [vmem:[#allocation2 + $0x2a0] sm:$0xf0]  ;;  %v3739_v58 = vld [vmem:[#allocation2 + $0x5d8] sm:$0xf] }
 0x1bd   :  { %2276 = vmatpush.bf16.msra.mxu0 %v3396_v12  ;;  %v3099_v12 = vld [vmem:[#allocation2 + $0xd8] sm:$0xf]  ;;  %v4035_v59 = vld [vmem:[#allocation2 + $0x5e8] sm:$0xf0] }
 0x1be   :  { %2289 = vmatpush.bf16.msrb.mxu1 %v3556_v13  ;;  %v3875_v13 = vld [vmem:[#allocation2 + $0xe8] sm:$0xf0] }
 0x1bf   :  { %2265 = vmatpush.bf16.msra.mxu3 %v3196_v17  ;;  %2300 = vmatpush.bf16.msrb.mxu2 %v3756_v18  ;;  %v3460_v17 = vor.u32 %v3965_v7, %v3459_v5  ;;  %v3676_v18 = vor.u32 %v4017_v8, %v3673_v10  ;;  %v3100_v23 = vor.u32 %v3875_v13, %v3099_v12  ;;  %v3379_v5 = vld [vmem:[#allocation2 + $0x308] sm:$0xf]  ;;  %v3019_v7 = vld [vmem:[#allocation2 + $0x38] sm:$0xf]  ;;  %v3855_v8 = vld [vmem:[#allocation2 + $0x48] sm:$0xf0] }
 0x1c0   :  { %v3579_v10 = vld [vmem:[#allocation2 + $0x498] sm:$0xf] }
 0x1c1   :  { %2277 = vmatpush.bf16.msra.mxu0 %v3376_v26  ;;  %v3653_v26 = vld [vmem:[#allocation2 + $0x544] sm:$0xf0] }
 0x1c2   :  { %2290 = vmatpush.bf16.msrb.mxu1 %v3536_v27  ;;  %v3079_v27 = vld [vmem:[#allocation2 + $0xb0] sm:$0xf]  ;;  %v3656_v35 = vor.u32 %v4012_v25, %v3653_v26  ;;  %v3990_v25 = vld [vmem:[#allocation2 + $0x480] sm:$0xf0] }
 0x1c3   :  { %2266 = vmatpush.bf16.msra.mxu3 %v3176_v31  ;;  %2301 = vmatpush.bf16.msrb.mxu2 %v3736_v33  ;;  %v3259_v31 = vld [vmem:[#allocation2 + $0x218] sm:$0xf]  ;;  %v3440_v33 = vor.u32 %v3960_v24, %v3439_v22  ;;  %v3080_v39 = vor.u32 %v3870_v29, %v3079_v27  ;;  %v2999_v22 = vld [vmem:[#allocation2 + $0x10] sm:$0xf]  ;;  %v3779_v27 = vld [vmem:[#allocation2 + $0x628] sm:$0xf] }
 0x1c4   :  { %v3260_v49 = vor.u32 %v3915_v36, %v3259_v31  ;;  %v3559_v24 = vld [vmem:[#allocation2 + $0x470] sm:$0xf]  ;;  %v4045_v29 = vld [vmem:[#allocation2 + $0x638] sm:$0xf0]  ;;  %v3179_v31 = vld [vmem:[#allocation2 + $0x178] sm:$0xf] }
 0x1c5   :  { %2278 = vmatpush.bf16.msra.mxu0 %v3356_v41  ;;  %v3633_v41 = vld [vmem:[#allocation2 + $0x51c] sm:$0xf0]  ;;  %v3560_v36 = vor.u32 %v3990_v25, %v3559_v24  ;;  %v4010_v24 = vld [vmem:[#allocation2 + $0x520] sm:$0xf0] }
 0x1c6   :  { %2291 = vmatpush.bf16.msrb.mxu1 %v3516_v45  ;;  %v3619_v45 = vld [vmem:[#allocation2 + $0x4e8] sm:$0xf] }
 0x1c7   :  { %2267 = vmatpush.bf16.msra.mxu3 %v3156_v50  ;;  %2302 = vmatpush.bf16.msrb.mxu2 %v3716_v48  ;;  %v3420_v50 = vor.u32 %v3955_v38, %v3419_v37  ;;  %v3636_v48 = vor.u32 %v4007_v40, %v3633_v41  ;;  %v3620_v55 = vor.u32 %v4005_v46, %v3619_v45  ;;  %v3339_v37 = vld [vmem:[#allocation2 + $0x2b8] sm:$0xf]  ;;  %v3935_v38 = vld [vmem:[#allocation2 + $0x2c8] sm:$0xf0]  ;;  %v3539_v40 = vld [vmem:[#allocation2 + $0x448] sm:$0xf] }
 0x1c8   :  { %v3985_v41 = vld [vmem:[#allocation2 + $0x458] sm:$0xf0]  ;;  %v4040_v45 = vld [vmem:[#allocation2 + $0x610] sm:$0xf0]  ;;  %v3340_v46 = vor.u32 %v3935_v38, %v3339_v37 }
 0x1c9   :  { %2279 = vmatpush.bf16.msra.mxu0 %v3336_v57  ;;  %v3950_v57 = vld [vmem:[#allocation2 + $0x340] sm:$0xf0] }
 0x1ca   :  { %2292 = vmatpush.bf16.msrb.mxu1 %v3496_v61  ;;  %2268 = vmatmul.bf16.vlgmr.msra.gmra.mxu3 %v4549_v34  ;;  %v4000_v61 = vld [vmem:[#allocation2 + $0x4d0] sm:$0xf0]  ;;  %v3400_v63 = vor.u32 %v3950_v57, %v3399_v56 }
 0x1cb   :  { %2312 = vmatpush.bf16.msrb.mxu3 %v3140_v54  ;;  %2303 = vmatpush.bf16.msrb.mxu2 %v3696_v2  ;;  %v3060_v54 = vor.u32 %v3865_v44, %v3059_v43  ;;  %v3905_v2 = vld [vmem:[#allocation2 + $0x1d8] sm:$0xf0]  ;;  %v3600_v4 = vor.u32 %v4000_v61, %v3599_v60  ;;  %v3759_v44 = vld [vmem:[#allocation2 + $0x600] sm:$0xf]  ;;  %v3980_v56 = vld [vmem:[#allocation2 + $0x430] sm:$0xf0]  ;;  %v3320_v60 = vor.u32 %v3930_v53, %v3319_v47 }
 0x1cc   :  { %v3220_v12 = vor.u32 %v3905_v2, %v3219_v0  ;;  %v3975_v0 = vld [vmem:[#allocation2 + $0x408] sm:$0xf0]  ;;  %v3719_v2 = vld [vmem:[#allocation2 + $0x5b0] sm:$0xf] }
 0x1cd   :  { %2280 = vmatpush.bf16.msra.mxu0 %v3316_v11  ;;  %v3995_v11 = vld [vmem:[#allocation2 + $0x4a8] sm:$0xf0] }
 0x1ce   :  { %2293 = vmatpush.bf16.msrb.mxu1 %v3476_v14  ;;  %v3199_v14 = vld [vmem:[#allocation2 + $0x1a0] sm:$0xf] }
 0x1cf   :  { %2313 = vmatpush.bf16.msrb.mxu3 %v3120_v6  ;;  %2304 = vmatpush.bf16.msrb.mxu2 %v3676_v18  ;;  %v3945_v6 = vld [vmem:[#allocation2 + $0x318] sm:$0xf0]  ;;  %v3580_v18 = vor.u32 %v3995_v11, %v3579_v10 }
 0x1d0   :  { %2281 = vmatmul.bf16.vlgmr.msra.gmra.mxu0 %v4555_v42  ;;  %v3380_v13 = vor.u32 %v3945_v6, %v3379_v5  ;;  %v3479_v6 = vld [vmem:[#allocation2 + $0x3d0] sm:$0xf] }
 0x1d1   :  { %2325 = vmatpush.bf16.msrb.mxu0 %v3300_v15  ;;  %2294 = vmatmul.bf16.vlgmr.msrb.gmra.mxu1 %v4569_v21  ;;  %v3900_v15 = vld [vmem:[#allocation2 + $0x1b0] sm:$0xf0] }
 0x1d2   :  { %2338 = vmatpush.bf16.msra.mxu1 %v3460_v17  ;;  %v3020_v17 = vor.u32 %v3855_v8, %v3019_v7  ;;  %v3200_v26 = vor.u32 %v3900_v15, %v3199_v14  ;;  %v3970_v7 = vld [vmem:[#allocation2 + $0x3e0] sm:$0xf0]  ;;  %v4025_v8 = vld [vmem:[#allocation2 + $0x598] sm:$0xf0] }
 0x1d3   :  { %2314 = vmatpush.bf16.msrb.mxu3 %v3100_v23  ;;  %2305 = vmatpush.bf16.msrb.mxu2 %v3656_v35  ;;  %v3850_v23 = vld [vmem:[#allocation2 + $0x20] sm:$0xf0]  ;;  %v3480_v10 = vor.u32 %v3970_v7, %v3479_v6 }
 0x1d4   :  { %v3000_v35 = vor.u32 %v3850_v23, %v2999_v22  ;;  %v4015_v22 = vld [vmem:[#allocation2 + $0x548] sm:$0xf0]  ;;  %v3639_v23 = vld [vmem:[#allocation2 + $0x510] sm:$0xf] }
 0x1d5   :  { %2326 = vmatpush.bf16.msrb.mxu0 %v3280_v30  ;;  %v3360_v30 = vor.u32 %v3940_v20, %v3359_v19  ;;  %v3659_v20 = vld [vmem:[#allocation2 + $0x538] sm:$0xf] }
 0x1d6   :  { %2339 = vmatpush.bf16.msra.mxu1 %v3440_v33  ;;  %v3895_v33 = vld [vmem:[#allocation2 + $0x188] sm:$0xf0] }
 0x1d7   :  { %2315 = vmatpush.bf16.msrb.mxu3 %v3080_v39  ;;  %2306 = vmatpush.bf16.msrb.mxu2 %v3636_v48  ;;  %v3780_v39 = vor.u32 %v4045_v29, %v3779_v27  ;;  %v3180_v43 = vor.u32 %v3895_v33, %v3179_v31  ;;  %v3540_v48 = vor.u32 %v3985_v41, %v3539_v40 }
 0x1d8   :  { %v3640_v29 = vor.u32 %v4010_v24, %v3639_v23 }
 0x1d9   :  { %2327 = vmatpush.bf16.msrb.mxu0 %v3260_v49  ;;  %v3159_v49 = vld [vmem:[#allocation2 + $0x150] sm:$0xf] }
 0x1da   :  { %2340 = vmatpush.bf16.msra.mxu1 %v3420_v50  ;;  %2307 = vmatmul.bf16.vlgmr.msrb.gmra.mxu2 %v4584_v52  ;;  %v3890_v50 = vld [vmem:[#allocation2 + $0x160] sm:$0xf0] }
 0x1db   :  { %2316 = vmatpush.bf16.msrb.mxu3 %v3060_v54  ;;  %2351 = vmatpush.bf16.msra.mxu2 %v3620_v55  ;;  %v3760_v54 = vor.u32 %v4040_v45, %v3759_v44  ;;  %v3519_v55 = vld [vmem:[#allocation2 + $0x420] sm:$0xf]  ;;  %v3160_v57 = vor.u32 %v3890_v50, %v3159_v49 }
 0x1dc   :  { %v3520_v61 = vor.u32 %v3980_v56, %v3519_v55 }
 0x1dd   :  { %2328 = vmatpush.bf16.msrb.mxu0 %v3240_v62  ;;  %v3740_v62 = vor.u32 %v4035_v59, %v3739_v58 }
 0x1de   :  { %2341 = vmatpush.bf16.msra.mxu1 %v3400_v63  ;;  %v3499_v63 = vld [vmem:[#allocation2 + $0x3f8] sm:$0xf] }
 0x1df   :  { %2317 = vmatpush.bf16.msrb.mxu3 %v3040_v3  ;;  %2352 = vmatpush.bf16.msra.mxu2 %v3600_v4  ;;  %v4030_v3 = vld [vmem:[#allocation2 + $0x5c0] sm:$0xf0]  ;;  %v3500_v4 = vor.u32 %v3975_v0, %v3499_v63 }
 0x1e0   :  { %v3720_v5 = vor.u32 %v4030_v3, %v3719_v2 }
 0x1e1   :  { %2329 = vmatpush.bf16.msrb.mxu0 %v3220_v12  ;;  %v3679_v12 = vld [vmem:[#allocation2 + $0x560] sm:$0xf] }
 0x1e2   :  { %2342 = vmatpush.bf16.msra.mxu1 %v3380_v13  ;;  %v4020_v13 = vld [vmem:[#allocation2 + $0x570] sm:$0xf0] }
 0x1e3   :  { %2318 = vmatpush.bf16.msrb.mxu3 %v3020_v17  ;;  %2353 = vmatpush.bf16.msra.mxu2 %v3580_v18 }
 0x1e5   :  { %2330 = vmatpush.bf16.msrb.mxu0 %v3200_v26 }
 0x1e6   :  { %2343 = vmatpush.bf16.msra.mxu1 %v3360_v30 }
 0x1e7   :  { %2319 = vmatpush.bf16.msrb.mxu3 %v3000_v35  ;;  %2354 = vmatpush.bf16.msra.mxu2 %v3560_v36 }
 0x1e9   :  { %2331 = vmatpush.bf16.msrb.mxu0 %v3180_v43 }
 0x1ea   :  { %2344 = vmatpush.bf16.msra.mxu1 %v3340_v46  ;;  %2320 = vmatmul.bf16.vlgmr.msrb.gmra.mxu3 %v4538_v9  ;;  %v3699_v9 = vld [vmem:[#allocation2 + $0x588] sm:$0xf] }
 0x1eb   :  { %2364 = vmatpush.bf16.msra.mxu3 %v3780_v39  ;;  %2355 = vmatpush.bf16.msra.mxu2 %v3540_v48  ;;  %v3700_v11 = vor.u32 %v4025_v8, %v3699_v9 }
 0x1ed   :  { %2332 = vmatpush.bf16.msrb.mxu0 %v3160_v57  ;;  %v2061_v14 = vpop.f32.mrf.mxu3  ;;  %v2074_v15 = vpop.f32.mrf.mxu0 }
 0x1ee   :  { %2345 = vmatpush.bf16.msra.mxu1 %v3320_v60  ;;  %v2075_v17 = vadd.f32 %v2074_v15, %v2061_v14  ;;  %v2087_v18 = vpop.f32.mrf.mxu1 }
 0x1ef   :  { %2365 = vmatpush.bf16.msra.mxu3 %v3760_v54  ;;  %2356 = vmatpush.bf16.msra.mxu2 %v3520_v61 }
 0x1f0   :  { %2333 = vmatmul.bf16.vlgmr.msrb.gmra.mxu0 %v4549_v34  ;;  %v3680_v34 = vor.u32 %v4020_v13, %v3679_v12  ;;  %v2088_v19 = vadd.f32 %v2087_v18, %v2075_v17 }
 0x1f1   :  { %2346 = vmatmul.bf16.vlgmr.msra.gmra.mxu1 %v4555_v42  ;;  %v3660_v42 = vor.u32 %v4015_v22, %v3659_v20 }
 0x1f3   :  { %2366 = vmatpush.bf16.msra.mxu3 %v3740_v62  ;;  %2357 = vmatpush.bf16.msra.mxu2 %v3500_v4 }
 0x1f5   :  { %v2063_v25 = vpop.f32.mrf.mxu3  ;;  %v2076_v26 = vpop.f32.mrf.mxu0 }
 0x1f6   :  { %v2089_v27 = vpop.f32.mrf.mxu1 }
 0x1f7   :  { %2367 = vmatpush.bf16.msra.mxu3 %v3720_v5  ;;  %2358 = vmatpush.bf16.msra.mxu2 %v3480_v10 }
 0x1fa   :  { %2359 = vmatmul.bf16.vlgmr.msra.gmra.mxu2 %v4569_v21 }
 0x1fb   :  { %2368 = vmatpush.bf16.msra.mxu3 %v3700_v11 }
 0x1fd   :  { %v2100_v30 = vpop.f32.mrf.mxu2  ;;  %v2126_v31 = vpop.f32.mrf.mxu0 }
 0x1fe   :  { %v2101_v33 = vadd.f32 %v2100_v30, %v2088_v19  ;;  %v2139_v35 = vpop.f32.mrf.mxu1 }
 0x1ff   :  { %2369 = vmatpush.bf16.msra.mxu3 %v3680_v34  ;;  %v2140_v36 = vadd.f32 %v2139_v35, %v2126_v31 }
 0x203   :  { %2370 = vmatpush.bf16.msra.mxu3 %v3660_v42  ;;  %v2113_v37 = vpop.f32.mrf.mxu3 }
 0x204   :  { %v2114_v38 = vadd.f32 %v2113_v37, %v2101_v33 }
 0x205   :  { %v2102_v21 = vpop.f32.mrf.mxu2  ;;  %v2128_v39 = vpop.f32.mrf.mxu0 }
 0x206   :  { %v2141_v40 = vpop.f32.mrf.mxu1  ;;  %v2377_v39 = vld [vmem:[%s4715_s5] sm:$0xff] }
 0x207   :  { %2371 = vmatpush.bf16.msra.mxu3 %v3640_v29  ;;  %v2378_v40 = vld [vmem:[%s4715_s5 + $0x8] sm:$0xff] }
 0x20a   :  { %2372 = vmatmul.bf16.vlgmr.msra.gmra.mxu3 %v4584_v52 }
 0x20b   :  { %v2115_v41 = vpop.f32.mrf.mxu3 }
 0x20d   :  { %v2152_v43 = vpop.f32.mrf.mxu2  ;;  %v2178_v44 = vpop.f32.mrf.mxu0 }
 0x20e   :  { %v2153_v45 = vadd.f32 %v2152_v43, %v2140_v36  ;;  %v2191_v46 = vpop.f32.mrf.mxu1 }
 0x213   :  { %v2165_v49 = vpop.f32.mrf.mxu3 }
 0x214   :  { %v2166_v50 = vadd.f32 %v2165_v49, %v2153_v45  ;;  %v2380_v45 = vunpack.c.l.bf16 %v2377_v39 }
 0x215   :  { %v2154_v48 = vpop.f32.mrf.mxu2  ;;  %v2180_v47 = vpop.f32.mrf.mxu0 }
 0x216   :  { %v2193_v53 = vpop.f32.mrf.mxu1  ;;  %v2179_v54 = vadd.f32 %v2178_v44, %v2166_v50  ;;  %v2379_v44 = vld [vmem:[%s4715_s5 + $0x10] sm:$0xf]  ;;  %v2381_v50 = vunpack.c.h.bf16 %v2377_v39  ;;  %v2382_v48 = vunpack.c.l.bf16 %v2378_v40 }
 0x218   :  { %v2390_v55 = vrot.slane %v2179_v54, 7  ;;  %v2383_v54 = vunpack.c.h.bf16 %v2378_v40 }
 0x21a   :  { %v2394_v52 = vsel %vm761_vm1, %v2114_v38, %v2390_v55  ;;  %v2402_v56 = vsel %vm2401_vm3, %v2114_v38, %v2390_v55  ;;  %v2384_v55 = vunpack.c.l.bf16 %v2379_v44 }
 0x21b   :  { %v2167_v57 = vpop.f32.mrf.mxu3 }
 0x21d   :  { %v2204_v58 = vpop.f32.mrf.mxu2 }
 0x21e   :  { %v2205_v59 = vadd.f32 %v2204_v58, %v2191_v46 }
 0x225   :  { %v2206_v60 = vpop.f32.mrf.mxu2 }
 0x22d   :  { %v2217_v61 = vpop.f32.mrf.mxu3  ;;  %v2230_v62 = vpop.f32.mrf.mxu0 }
 0x22e   :  { %v2218_v63 = vadd.f32 %v2217_v61, %v2205_v59  ;;  %v2243_v0 = vpop.f32.mrf.mxu1 }
 0x230   :  { %v2231_v2 = vadd.f32 %v2230_v62, %v2218_v63 }
 0x232   :  { %v2244_v3 = vadd.f32 %v2243_v0, %v2231_v2 }
 0x234   :  { %v2391_v4 = vrot.slane %v2244_v3, 6 }
 0x235   :  { %v2219_v5 = vpop.f32.mrf.mxu3  ;;  %v2232_v6 = vpop.f32.mrf.mxu0 }
 0x236   :  { %v2396_v7 = vsel %vm2395_vm2, %v2394_v52, %v2391_v4  ;;  %v2404_v9 = vsel %vm2403_vm4, %v2402_v56, %v2391_v4  ;;  %v2245_v8 = vpop.f32.mrf.mxu1 }
 0x23d   :  { %v2256_v10 = vpop.f32.mrf.mxu2 }
 0x245   :  { %v2258_v11 = vpop.f32.mrf.mxu2 }
 0x24d   :  { %v2269_v12 = vpop.f32.mrf.mxu3  ;;  %v2282_v13 = vpop.f32.mrf.mxu0 }
 0x24e   :  { %v2295_v14 = vpop.f32.mrf.mxu1  ;;  %v2270_v27 = vadd.f32 %v2269_v12, %v2256_v10 }
 0x250   :  { %v2283_v29 = vadd.f32 %v2282_v13, %v2270_v27 }
 0x252   :  { %v2296_v33 = vadd.f32 %v2295_v14, %v2283_v29 }
 0x255   :  { %v2271_v15 = vpop.f32.mrf.mxu3  ;;  %v2284_v17 = vpop.f32.mrf.mxu0 }
 0x256   :  { %v2297_v18 = vpop.f32.mrf.mxu1 }
 0x25d   :  { %v2308_v34 = vpop.f32.mrf.mxu2 }
 0x25e   :  { %v2309_v36 = vadd.f32 %v2308_v34, %v2296_v33 }
 0x260   :  { %v2392_v41 = vrot.slane %v2309_v36, 5 }
 0x265   :  { %v2310_v19 = vpop.f32.mrf.mxu2 }
 0x26d   :  { %v2321_v20 = vpop.f32.mrf.mxu3  ;;  %v2334_v22 = vpop.f32.mrf.mxu0 }
 0x26e   :  { %v2347_v42 = vpop.f32.mrf.mxu1  ;;  %v2335_v30 = vadd.f32 %v2334_v22, %v2321_v20 }
 0x270   :  { %v2348_v35 = vadd.f32 %v2347_v42, %v2335_v30 }
 0x275   :  { %v2323_v23 = vpop.f32.mrf.mxu3  ;;  %v2336_v24 = vpop.f32.mrf.mxu0 }
 0x276   :  { %v2349_v25 = vpop.f32.mrf.mxu1 }
 0x27d   :  { %v2360_v26 = vpop.f32.mrf.mxu2 }
 0x27e   :  { %v2361_v37 = vadd.f32 %v2360_v26, %v2348_v35  ;;  %v2465_v35 = vpop.xlane.xlu0 %2464 }
 0x27f   :  { %4057 = vrsqrt.f32 %v2465_v35  ;;  %vm2473_vm9 = vcmp.eq.f32.partialorder %v2465_v35, inf  ;;  %v2476_v44 = vand.u32 2147483648, %v2465_v35  ;;  %vm2475_vm10 = vcmp.eq.f32.partialorder %v2465_v35, 0.0 }
 0x285   :  { %v2362_v31 = vpop.f32.mrf.mxu2  ;;  %v4058_v36 = vpop.eup %4057 }
 0x28d   :  { %v2373_v38 = vpop.f32.mrf.mxu3 }
 0x28e   :  { %v2374_v21 = vadd.f32 %v2373_v38, %v2361_v37  ;;  %v2467_v37 = vmul.f32 %v4058_v36, %v2465_v35 }
 0x290   :  { %v2393_v43 = vrot.slane %v2374_v21, 4  ;;  %v2468_v38 = vmul.f32 %v4058_v36, %v2467_v37 }
 0x292   :  { %v2398_v46 = vsel %vm2397_vm5, %v2392_v41, %v2393_v43  ;;  %v2406_v49 = vsel %vm2405_vm7, %v2392_v41, %v2393_v43  ;;  %v2469_v21 = vmul.f32 0.5, %v2468_v38 }
 0x293   :  { %v2400_v47 = vsel %vm2399_vm6, %v2396_v7, %v2398_v46  ;;  %v2408_v53 = vsel %vm2407_vm8, %v2404_v9, %v2406_v49 }
 0x294   :  { %v2409_v52 = vrot.slane %v2408_v53, 1  ;;  %v2410_v56 = vperm.slane %v2400_v47, 0  ;;  %v2411_v57 = vperm.slane %v2400_v47, 1  ;;  %v2412_v58 = vperm.slane %v2400_v47, 2 }
 0x295   :  { %v2375_v59 = vpop.f32.mrf.mxu3  ;;  %v2413_v60 = vperm.slane %v2400_v47, 3  ;;  %v2414_v61 = vperm.slane %v2400_v47, 4  ;;  %v2470_v39 = vsub.f32 1.5, %v2469_v21 }
 0x296   :  { %v4627_v62 = vadd.f32 %v2410_v56, %v2380_v45  ;;  %v4629_v63 = vadd.f32 %v2411_v57, %v2381_v50  ;;  %v4631_v0 = vadd.f32 %v2412_v58, %v2382_v48  ;;  %v2415_v2 = vperm.slane %v2409_v52, 0 }
 0x297   :  { %v4633_v3 = vadd.f32 %v2413_v60, %v2383_v54  ;;  %v4635_v4 = vadd.f32 %v2414_v61, %v2384_v55  ;;  %v2416_v5 = vperm.slane %v2409_v52, 1  ;;  %v2417_v6 = vperm.slane %v2409_v52, 2 }
 0x298   :  { %2441 = vst [vmem:[#allocation6 + $0x8] sm:$0xff] %v4629_v63  ;;  %v2498_v7 = vmul.f32 %v4627_v62, %v4627_v62  ;;  %v2499_v9 = vmul.f32 %v4629_v63, %v4629_v63  ;;  %v2418_v8 = vperm.slane %v2409_v52, 3  ;;  %v2419_v10 = vperm.slane %v2409_v52, 4 }
 0x299   :  { %2442 = vst [vmem:[#allocation6 + $0x10] sm:$0xff] %v4631_v0  ;;  %v4643_v11 = vadd.f32 %v2415_v2, %v2380_v45  ;;  %v2500_v12 = vmul.f32 %v4631_v0, %v4631_v0  ;;  %v4648_v14 = vadd.f32 %v2416_v5, %v2381_v50  ;;  %v4650_v15 = vadd.f32 %v2417_v6, %v2382_v48 }
 0x29a   :  { %2443 = vst [vmem:[#allocation6 + $0x18] sm:$0xff] %v4633_v3  ;;  %v2508_v13 = vadd.f32 %v2499_v9, %v2498_v7  ;;  %v4653_v17 = vadd.f32 %v2418_v8, %v2383_v54  ;;  %v2501_v34 = vmul.f32 %v4633_v3, %v4633_v3  ;;  %v4660_v20 = vadd.f32 %v2419_v10, %v2384_v55 }
 0x29b   :  { %2444 = vst [vmem:[#allocation6 + $0x20] sm:$0xff] %v4635_v4  ;;  %v2503_v18 = vmul.f32 %v4643_v11, %v4643_v11  ;;  %v2504_v22 = vmul.f32 %v4648_v14, %v4648_v14  ;;  %v2502_v42 = vmul.f32 %v4635_v4, %v4635_v4  ;;  %v2505_v24 = vmul.f32 %v4650_v15, %v4650_v15 }
 0x29c   :  { %v2509_v19 = vadd.f32 %v2508_v13, %v2500_v12  ;;  %2440 = vst [vmem:[#allocation6] sm:$0xff] %v4627_v62  ;;  %v2506_v27 = vmul.f32 %v4653_v17, %v4653_v17  ;;  %v2507_v30 = vmul.f32 %v4660_v20, %v4660_v20  ;;  %v2471_v40 = vmul.f32 %v4058_v36, %v2470_v39 }
 0x29d   :  { %2446 = vst [vmem:[#allocation6 + $0x30] sm:$0xff] %v4648_v14  ;;  %v2514_v25 = vadd.f32 %v2504_v22, %v2503_v18 }
 0x29e   :  { %v2510_v23 = vadd.f32 %v2509_v19, %v2501_v34  ;;  %2447 = vst [vmem:[#allocation6 + $0x38] sm:$0xff] %v4650_v15  ;;  %v2472_v41 = vmul.f32 %v2471_v40, %v2465_v35 }
 0x29f   :  { %2448 = vst [vmem:[#allocation6 + $0x40] sm:$0xff] %v4653_v17  ;;  %v2515_v29 = vadd.f32 %v2514_v25, %v2505_v24 }
 0x2a0   :  { %v2511_v26 = vadd.f32 %v2510_v23, %v2502_v42  ;;  %2449 = vst [vmem:[#allocation6 + $0x48] sm:$0xff] %v4660_v20  ;;  %v2474_v43 = vsel %vm2473_vm9, %v2465_v35, %v2472_v41 }
 0x2a1   :  { %2445 = vst [vmem:[#allocation6 + $0x28] sm:$0xff] %v4643_v11  ;;  %v2516_v31 = vadd.f32 %v2515_v29, %v2506_v27  ;;  %v2477_v45 = vsel %vm2475_vm10, %v2476_v44, %v2474_v43 }
 0x2a2   :  { %2512 = vadd.xlane.f32.xlu0 %v2511_v26  ;;  %v2478_v46 = vmax.f32 %v2477_v45, 1e-12  ;;  %2689 = dma.vmem_to_hbm [thread:$0]  %s2682_s6, 1280, %s2684_s20, [#allocation7], %s4177_s22, %s4177_s22, %s4178_s23  }
 0x2a3   :  { %v2517_v33 = vadd.f32 %v2516_v31, %v2507_v30 }
 0x2a4   :  { %4059 = vrcp.f32 %v2478_v46  ;;  %v2490_v59 = vand.u32 2147483648, %v2478_v46  ;;  %vm2484_vm12 = vweird.f32 %v2478_v46  ;;  %v2488_v60 = vand.u32 2147483647, %v2478_v46 }
 0x2a5   :  { %2518 = vadd.xlane.f32.xlu1 %v2517_v33 }
 0x2a6   :  { %v2491_v9 = vor.u32 1.1754944e-38, %v2490_v59  ;;  %vm2489_vm14 = vcmp.eq.f32.partialorder %v2488_v60, 8.507059e+37 }
 0x2aa   :  { %v4060_v49 = vpop.eup %4059 }
 0x2ab   :  { %v2480_v50 = vmul.f32 %v4060_v49, %v2478_v46  ;;  %vm2485_vm11 = vweird.f32 %v4060_v49 }
 0x2ac   :  { %vm2486_vm13 = vmor %vm2484_vm12, %vm2485_vm11 }
 0x2ad   :  { %v2481_v47 = vsub.f32 1.0, %v2480_v50 }
 0x2af   :  { %v2482_v54 = vmul.f32 %v4060_v49, %v2481_v47 }
 0x2b1   :  { %v2483_v56 = vadd.f32 %v4060_v49, %v2482_v54 }
 0x2b3   :  { %v2487_v5 = vsel %vm2486_vm13, %v4060_v49, %v2483_v56  ;;  %vm2662_vm13 = vcmask 58368  }
 0x2b4   :  { %v2492_v12 = vsel %vm2489_vm14, %v2491_v9, %v2487_v5 }
 0x2b5   :  { %v2494_v19 = vmul.f32 %v2492_v12, %v4542_v28  ;;  %v2495_v24 = vmul.f32 %v2492_v12, %v4545_v32  ;;  %v2496_v27 = vmul.f32 %v2492_v12, %v4565_v16  ;;  %v2497_v29 = vmul.f32 %v2492_v12, %v4580_v51 }
 0x2b6   :  { %v2493_v28 = vmul.f32 %v2492_v12, %v4532_v1 }
 0x2b7   :  { %v2589_v31 = vrot.slane %v2494_v19, 7  ;;  %v2590_v37 = vrot.slane %v2495_v24, 6  ;;  %v2591_v38 = vrot.slane %v2496_v27, 5  ;;  %v2592_v21 = vrot.slane %v2497_v29, 4 }
 0x2b9   :  { %v2597_v32 = vsel %vm2401_vm3, %v2493_v28, %v2589_v31  ;;  %v2599_v51 = vsel %vm2405_vm7, %v2591_v38, %v2592_v21  ;;  %v2593_v41 = vsel %vm761_vm1, %v2493_v28, %v2589_v31  ;;  %v2595_v45 = vsel %vm2397_vm5, %v2591_v38, %v2592_v21 }
 0x2ba   :  { %v2598_v16 = vsel %vm2403_vm4, %v2597_v32, %v2590_v37  ;;  %v2594_v49 = vsel %vm2395_vm2, %v2593_v41, %v2590_v37 }
 0x2bb   :  { %v2600_v1 = vsel %vm2407_vm8, %v2598_v16, %v2599_v51  ;;  %v2596_v54 = vsel %vm2399_vm6, %v2594_v49, %v2595_v45  ;;  %v4180_v51 = vmov 0.07  }
 0x2bc   :  { %v2603_v9 = vperm.slane %v2596_v54, 1  ;;  %v2605_v19 = vperm.slane %v2596_v54, 3  ;;  %v2606_v27 = vperm.slane %v2596_v54, 4 }
 0x315   :  { %v2513_v48 = vpop.xlane.xlu0 %2512 }
 0x316   :  { %4061 = vrsqrt.f32 %v2513_v48  ;;  %vm2527_vm15 = vcmp.eq.f32.partialorder %v2513_v48, inf  ;;  %v2530_v34 = vand.u32 2147483648, %v2513_v48  ;;  %vm2529_vm0 = vcmp.eq.f32.partialorder %v2513_v48, 0.0 }
 0x318   :  { %v2519_v53 = vpop.xlane.xlu1 %2518 }
 0x319   :  { %4063 = vrsqrt.f32 %v2519_v53  ;;  %vm2539_vm9 = vcmp.eq.f32.partialorder %v2519_v53, inf  ;;  %v2542_v30 = vand.u32 2147483648, %v2519_v53  ;;  %vm2541_vm10 = vcmp.eq.f32.partialorder %v2519_v53, 0.0 }
 0x31c   :  { %v4062_v55 = vpop.eup %4061 }
 0x31d   :  { %v2521_v52 = vmul.f32 %v4062_v55, %v2513_v48 }
 0x31f   :  { %v2522_v57 = vmul.f32 %v4062_v55, %v2521_v52  ;;  %v4064_v58 = vpop.eup %4063  ;;  %v2601_v52 = vrot.slane %v2600_v1, 1 }
 0x320   :  { %v2533_v2 = vmul.f32 %v4064_v58, %v2519_v53 }
 0x321   :  { %v2523_v61 = vmul.f32 0.5, %v2522_v57  ;;  %v2610_v38 = vperm.slane %v2601_v52, 3 }
 0x322   :  { %v2534_v7 = vmul.f32 %v4064_v58, %v2533_v2 }
 0x323   :  { %v2524_v6 = vsub.f32 1.5, %v2523_v61  ;;  %v2602_v61 = vperm.slane %v2596_v54, 0 }
 0x324   :  { %v2535_v10 = vmul.f32 0.5, %v2534_v7 }
 0x325   :  { %v2525_v8 = vmul.f32 %v4062_v55, %v2524_v6 }
 0x326   :  { %v2536_v18 = vsub.f32 1.5, %v2535_v10 }
 0x327   :  { %v2526_v13 = vmul.f32 %v2525_v8, %v2513_v48  ;;  %v2604_v8 = vperm.slane %v2596_v54, 2 }
 0x328   :  { %v2537_v42 = vmul.f32 %v4064_v58, %v2536_v18 }
 0x329   :  { %v2528_v22 = vsel %vm2527_vm15, %v2513_v48, %v2526_v13 }
 0x32a   :  { %v2531_v23 = vsel %vm2529_vm0, %v2530_v34, %v2528_v22  ;;  %v2538_v26 = vmul.f32 %v2537_v42, %v2519_v53  ;;  %v2607_v42 = vperm.slane %v2601_v52, 0 }
 0x32b   :  { %v2544_v25 = vmax.f32 %v2531_v23, 1e-12 }
 0x32c   :  { %v2540_v33 = vsel %vm2539_vm9, %v2519_v53, %v2538_v26 }
 0x32d   :  { %4065 = vrcp.f32 %v2544_v25  ;;  %v2543_v35 = vsel %vm2541_vm10, %v2542_v30, %v2540_v33  ;;  %v2557_v46 = vand.u32 2147483648, %v2544_v25  ;;  %v2555_v48 = vand.u32 2147483647, %v2544_v25 }
 0x32e   :  { %v2545_v36 = vmax.f32 %v2543_v35, 1e-12  ;;  %vm2551_vm4 = vweird.f32 %v2544_v25  ;;  %v2609_v33 = vperm.slane %v2601_v52, 2 }
 0x32f   :  { %v2558_v56 = vor.u32 1.1754944e-38, %v2557_v46  ;;  %vm2556_vm7 = vcmp.eq.f32.partialorder %v2555_v48, 8.507059e+37  ;;  %v2656_v46 = vlaneseq }
 0x330   :  { %4067 = vrcp.f32 %v2545_v36  ;;  %v2576_v59 = vand.u32 2147483648, %v2545_v36  ;;  %v2574_v2 = vand.u32 2147483647, %v2545_v36  ;;  %vm2570_vm2 = vweird.f32 %v2545_v36 }
 0x331   :  { %4069 = vrcp.f32 %v4180_v51  ;;  %v2657_v48 = vand.u32 127, %v2656_v46 }
 0x332   :  { %v2577_v34 = vor.u32 1.1754944e-38, %v2576_v59  ;;  %vm2575_vm8 = vcmp.eq.f32.partialorder %v2574_v2, 8.507059e+37 }
 0x333   :  { %v4066_v39 = vpop.eup %4065 }
 0x334   :  { %v2547_v40 = vmul.f32 %v4066_v39, %v2544_v25  ;;  %vm2552_vm11 = vweird.f32 %v4066_v39 }
 0x335   :  { %vm2553_vm1 = vmor %vm2551_vm4, %vm2552_vm11 }
 0x336   :  { %v2548_v43 = vsub.f32 1.0, %v2547_v40  ;;  %v4068_v44 = vpop.eup %4067  ;;  %v4181_v40 = vmov 0.0  }
 0x337   :  { %v2566_v47 = vmul.f32 %v4068_v44, %v2545_v36  ;;  %vm2571_vm5 = vweird.f32 %v4068_v44  ;;  %2653 = vst [vmem:[#allocation8] sm:$0x3] %v4181_v40  ;;  %v4070_v41 = vpop.eup %4069 }
 0x338   :  { %v2549_v50 = vmul.f32 %v4066_v39, %v2548_v43  ;;  %vm2572_vm6 = vmor %vm2570_vm2, %vm2571_vm5  ;;  %v2645_v43 = vmul.f32 0.07, %v4070_v41  ;;  %vm2649_vm12 = vweird.f32 %v4070_v41 }
 0x339   :  { %v2567_v55 = vsub.f32 1.0, %v2566_v47 }
 0x33a   :  { %v2550_v53 = vadd.f32 %v4066_v39, %v2549_v50 }
 0x33b   :  { %v2568_v58 = vmul.f32 %v4068_v44, %v2567_v55 }
 0x33c   :  { %v2554_v57 = vsel %vm2553_vm1, %v4066_v39, %v2550_v53 }
 0x33d   :  { %v2559_v60 = vsel %vm2556_vm7, %v2558_v56, %v2554_v57  ;;  %v2569_v10 = vadd.f32 %v4068_v44, %v2568_v58 }
 0x33e   :  { %v2560_v5 = vmul.f32 %v2559_v60, %v4627_v62  ;;  %v2561_v6 = vmul.f32 %v2559_v60, %v4629_v63  ;;  %v2562_v7 = vmul.f32 %v2559_v60, %v4631_v0  ;;  %v2563_v12 = vmul.f32 %v2559_v60, %v4633_v3 }
 0x33f   :  { %v2573_v22 = vsel %vm2572_vm6, %v4068_v44, %v2569_v10  ;;  %v2564_v62 = vmul.f32 %v2559_v60, %v4635_v4  ;;  %v2608_v3 = vperm.slane %v2601_v52, 1  ;;  %v2646_v44 = vsub.f32 1.0, %v2645_v43 }
 0x340   :  { %v2622_v13 = vmul.f32 %v2602_v61, %v2560_v5  ;;  %v2623_v18 = vmul.f32 %v2603_v9, %v2561_v6  ;;  %v2624_v23 = vmul.f32 %v2604_v8, %v2562_v7  ;;  %v2578_v24 = vsel %vm2575_vm8, %v2577_v34, %v2573_v22 }
 0x341   :  { %v2579_v0 = vmul.f32 %v2578_v24, %v4643_v11  ;;  %v2580_v25 = vmul.f32 %v2578_v24, %v4648_v14  ;;  %v2581_v26 = vmul.f32 %v2578_v24, %v4650_v15  ;;  %v2625_v29 = vmul.f32 %v2605_v19, %v2563_v12 }
 0x342   :  { %v2632_v63 = vadd.f32 %v2623_v18, %v2622_v13  ;;  %v2582_v31 = vmul.f32 %v2578_v24, %v4653_v17  ;;  %v2626_v36 = vmul.f32 %v2606_v27, %v2564_v62  ;;  %v2583_v37 = vmul.f32 %v2578_v24, %v4660_v20 }
 0x343   :  { %v2627_v35 = vmul.f32 %v2607_v42, %v2579_v0  ;;  %v2628_v28 = vmul.f32 %v2608_v3, %v2580_v25  ;;  %v2629_v21 = vmul.f32 %v2609_v33, %v2581_v26  ;;  %v2611_v14 = vperm.slane %v2601_v52, 4 }
 0x344   :  { %v2633_v30 = vadd.f32 %v2632_v63, %v2624_v23  ;;  %v2630_v15 = vmul.f32 %v2610_v38, %v2582_v31  ;;  %v2647_v45 = vmul.f32 %v4070_v41, %v2646_v44 }
 0x345   :  { %v2638_v11 = vadd.f32 %v2628_v28, %v2627_v35  ;;  %v2631_v17 = vmul.f32 %v2611_v14, %v2583_v37 }
 0x346   :  { %v2634_v4 = vadd.f32 %v2633_v30, %v2625_v29  ;;  %v2648_v1 = vadd.f32 %v4070_v41, %v2647_v45 }
 0x347   :  { %v2639_v39 = vadd.f32 %v2638_v11, %v2629_v21 }
 0x348   :  { %v2635_v32 = vadd.f32 %v2634_v4, %v2626_v36  ;;  %v2650_v49 = vsel %vm2649_vm12, %v4070_v41, %v2648_v1 }
 0x349   :  { %v2640_v16 = vadd.f32 %v2639_v39, %v2630_v15 }
 0x34a   :  { %2636 = vadd.xlane.f32.xlu1 %v2635_v32 }
 0x34b   :  { %v2641_v20 = vadd.f32 %v2640_v16, %v2631_v17 }
 0x34d   :  { %2642 = vadd.xlane.f32.xlu2 %v2641_v20 }
 0x3bd   :  { %v2637_v50 = vpop.xlane.xlu1 %2636 }
 0x3be   :  { %v2651_v47 = vmul.f32 %v2650_v49, %v2637_v50 }
 0x3c0   :  { %v2643_v53 = vpop.xlane.xlu2 %2642  ;;  %v2658_v55 = vperm.slane %v2651_v47, %v2657_v48 }
 0x3c1   :  { %v2652_v54 = vmul.f32 %v2650_v49, %v2643_v53 }
 0x3c3   :  { %v2659_v52 = vperm.slane %v2652_v54, %v2657_v48 }
 0x3c5   :  { %v2660_v56 = vsel %vm2401_vm3, %v2659_v52, %v2658_v55 }
 0x3c6   :  { %2663 = vst.msk [vmem:[#allocation8] sm:$0x3] %vm2662_vm13, %v2660_v56 }
 0x3c7   :  { %2700 = dma.vmem_to_hbm [thread:$0]  %s2696_s8, 32, %s2698_s1, [#allocation7]  }
 0x3c8   :  { %4169 = dma.done.wait [#allocation4], 1280  }
 0x3c9   :  { %4170 = vsyncadd [#allocation4], 4294966016 }
 0x3ca   :  { %4171 = dma.done.wait [#allocation7], 1312  }
 0x3cb   :  { %4172 = vsyncadd [#allocation7], 4294965984 }
 0x3cc   :  { %2713 = vsyncpa [#allocation3], 1 }
 0x3cd   :  { %2714 = vsyncpa [#allocation4], 1 }
 0x3ce   :  { %2715 = vsyncpa [#allocation7], 1 }

</bundles_post_ra>
